<compile_context>
chip_gen: v7x
topology: tpu7x:2x2x1
jax: 0.10.0
libtpu: 0.0.40
codegen_flags: <defaults>
</compile_context>

<pallas_src>
import functools
import math

import jax
import jax.numpy as jnp
from jax.experimental import pallas as pl
from jax.experimental.pallas import tpu as pltpu


def _round_up(x, m):
    return ((x + m - 1) // m) * m


def _conv_out_hw(h, k, s):
    return (h - k) // s + 1


_LANE = 128
# Budget for the pipeline's double-buffered tiles + resident weights; leaves
# ample headroom inside v7x's 64 MiB physical VMEM.
_PIPELINE_VMEM_BUDGET = 28 * 1024 * 1024
_VMEM_LIMIT_CAP = 48 * 1024 * 1024


# ---------------------------------------------------------------------------
# Pallas kernel: fused (x @ w + b) with optional ReLU.
#   x tile : (TM, K)  bf16     w : (K, TN) bf16     b : (1, TN) f32
#   out    : (TM, TN) f32/bf16; accumulation always in f32 on the MXU.
# ---------------------------------------------------------------------------
def _linear_kernel(relu, x_ref, w_ref, b_ref, o_ref):
    acc = jnp.dot(x_ref[...], w_ref[...], preferred_element_type=jnp.float32)
    acc = acc + b_ref[...]                      # (1, TN) broadcast over rows
    if relu:
        acc = jnp.maximum(acc, 0.0)
    o_ref[...] = acc.astype(o_ref.dtype)


def _tile_plan(M, K, N, out_bytes):
    """Pick (tm, tn): big row tiles within the VMEM budget, and >=2 grid steps
    whenever there is enough work (keeps both v7x TensorCores busy)."""
    tm = min(1024, _round_up(M, 16))
    per_row = 2 * (K * 2 + N * out_bytes)                       # x + out, x2 buffered
    resident = 2 * (K * N * 2 + _round_up(N, _LANE) * 4 * 8)    # w + bias
    while tm > 16 and per_row * tm + resident > _PIPELINE_VMEM_BUDGET:
        tm = _round_up(tm // 2, 16)

    tn = N
    if pl.cdiv(M, tm) == 1:
        if N >= 2 * _LANE:
            # Split output columns (e.g. fc1: 512 -> 2 x 256), lane-dense tiles.
            tn = max(_LANE, ((N // 2) // _LANE) * _LANE)
        elif M >= 32:
            # Split rows instead (conv layers with a single-step grid).
            tm = _round_up(pl.cdiv(M, 2), 16)
    return tm, tn


def pallas_linear(x, w, b, *, relu, out_dtype=jnp.float32, fuse_input=False):
    """y = relu?(x @ w + b).  x:(M,K), w:(K,N) (N % 128 == 0), b:(N,)."""
    M, K = x.shape
    K2, N = w.shape
    assert K == K2, (K, K2)
    assert N % _LANE == 0, N

    x = x.astype(jnp.bfloat16)                  # no-op if already bf16
    w = w.astype(jnp.bfloat16)
    b2 = b.astype(jnp.float32).reshape(1, N)

    out_size = jnp.dtype(out_dtype).itemsize
    tm, tn = _tile_plan(M, K, N, out_size)
    grid = (pl.cdiv(M, tm), pl.cdiv(N, tn))

    # Actual double-buffered tile footprint + headroom (instead of a fixed cap).
    footprint = (2 * tm * K * 2 + 2 * tm * tn * out_size
                 + 2 * K * tn * 2 + 2 * 8 * tn * 4)
    vmem_limit = min(_VMEM_LIMIT_CAP,
                     max(footprint + 8 * 1024 * 1024, 16 * 1024 * 1024))

    cost = pl.CostEstimate(
        flops=2 * M * K * N,
        transcendentals=0,
        bytes_accessed=M * K * 2 + K * N * 2 + N * 4 + M * N * out_size,
    )

    return pl.pallas_call(
        functools.partial(_linear_kernel, relu),
        out_shape=jax.ShapeDtypeStruct((M, N), out_dtype),
        grid=grid,
        in_specs=[
            pl.BlockSpec((tm, K), lambda i, j: (i, 0)),   # row tile of x
            pl.BlockSpec((K, tn), lambda i, j: (0, j)),   # weight column tile
            pl.BlockSpec((1, tn), lambda i, j: (0, j)),   # bias column tile
        ],
        out_specs=pl.BlockSpec((tm, tn), lambda i, j: (i, j)),
        compiler_params=pltpu.CompilerParams(
            dimension_semantics=("parallel", "parallel"),
            vmem_limit_bytes=vmem_limit,
            # Let XLA fuse the im2col slice/concat producer into the operand,
            # avoiding an HBM round trip of the k^2-inflated patches.
            allow_input_fusion=[True, False, False] if fuse_input else None,
        ),
        cost_estimate=cost,
    )(x, w, b2)


# ---------------------------------------------------------------------------
# Fused FC head (small batch / latency path): q = relu(x@W1+b1) @ W2 + b2
# in a single pallas_call — removes one kernel launch and the HBM round trip
# of the fc1 activation.
# ---------------------------------------------------------------------------
def _fc_head_kernel(x_ref, w1_ref, b1_ref, w2_ref, b2_ref, o_ref):
    h = jnp.dot(x_ref[...], w1_ref[...], preferred_element_type=jnp.float32)
    h = jnp.maximum(h + b1_ref[...], 0.0).astype(jnp.bfloat16)
    q = jnp.dot(h, w2_ref[...], preferred_element_type=jnp.float32)
    o_ref[...] = (q + b2_ref[...]).astype(o_ref.dtype)


def pallas_fc_head(x, w1, b1, w2, b2_pad):
    M, K1 = x.shape
    _, H = w1.shape            # 512
    _, N = w2.shape            # n_actions padded to 128
    assert N % _LANE == 0

    x = x.astype(jnp.bfloat16)
    tm = _round_up(M, 16)
    grid = (pl.cdiv(M, tm),)

    footprint = (2 * tm * K1 * 2 + 2 * K1 * H * 2 + 2 * 8 * H * 4
                 + 2 * H * N * 2 + 2 * 8 * N * 4 + 2 * tm * N * 4)
    vmem_limit = min(_VMEM_LIMIT_CAP,
                     max(footprint + 8 * 1024 * 1024, 16 * 1024 * 1024))
    cost = pl.CostEstimate(
        flops=2 * M * K1 * H + 2 * M * H * N,
        transcendentals=0,
        bytes_accessed=M * K1 * 2 + K1 * H * 2 + H * 4 + H * N * 2 + N * 4 + M * N * 4,
    )

    return pl.pallas_call(
        _fc_head_kernel,
        out_shape=jax.ShapeDtypeStruct((M, N), jnp.float32),
        grid=grid,
        in_specs=[
            pl.BlockSpec((tm, K1), lambda i: (i, 0)),
            pl.BlockSpec((K1, H), lambda i: (0, 0)),
            pl.BlockSpec((1, H), lambda i: (0, 0)),
            pl.BlockSpec((H, N), lambda i: (0, 0)),
            pl.BlockSpec((1, N), lambda i: (0, 0)),
        ],
        out_specs=pl.BlockSpec((tm, N), lambda i: (i, 0)),
        compiler_params=pltpu.CompilerParams(
            dimension_semantics=("parallel",),
            vmem_limit_bytes=vmem_limit,
        ),
        cost_estimate=cost,
    )(x, w1.astype(jnp.bfloat16), b1.astype(jnp.float32).reshape(1, H),
      w2.astype(jnp.bfloat16), b2_pad.astype(jnp.float32).reshape(1, N))


# ---------------------------------------------------------------------------
# im2col on channel-last activations (pure data movement; with
# allow_input_fusion XLA may fuse it into the pallas_call operand). Patch
# features are ordered (kh, kw, c), matching prepare_params()' weight layout.
# ---------------------------------------------------------------------------
def _im2col_nhwc(x_nhwc, k, s, c_in):
    B, H, W, _ = x_nhwc.shape
    Ho = (H - k) // s + 1
    Wo = (W - k) // s + 1
    xc = x_nhwc[..., :c_in]                     # slice channels once, not k*k times
    cols = []
    for i in range(k):
        for j in range(k):
            cols.append(xc[:, i:i + s * Ho:s, j:j + s * Wo:s, :])
    patches = jnp.concatenate(cols, axis=-1)    # (B, Ho, Wo, k*k*c_in)
    return patches.reshape(B * Ho * Wo, k * k * c_in), Ho, Wo


def conv2d_pallas(x_nhwc, w_kkc_o, b_pad, *, k, stride, c_in, relu):
    """x: (B,H,W,C_pad) -> (B,Ho,Wo,128); only the first c_in channels are real."""
    B = x_nhwc.shape[0]
    patches, Ho, Wo = _im2col_nhwc(x_nhwc, k, stride, c_in)
    y = pallas_linear(patches, w_kkc_o, b_pad, relu=relu,
                      out_dtype=jnp.bfloat16, fuse_input=True)
    return y.reshape(B, Ho, Wo, y.shape[-1])


# ---------------------------------------------------------------------------
# Parameters: raw (PyTorch layout) init + one-time preparation for the kernels.
# ---------------------------------------------------------------------------
def init_dqn_params(key, input_shape, n_actions):
    c, h, w = input_shape
    keys = jax.random.split(key, 10)

    def u(k_, shape, fan_in):
        bound = 1.0 / math.sqrt(fan_in)       # PyTorch-style uniform bound
        return jax.random.uniform(k_, shape, jnp.float32, -bound, bound)

    p = {}
    p["w1"] = u(keys[0], (32, c, 8, 8), c * 8 * 8)
    p["b1"] = u(keys[1], (32,), c * 8 * 8)
    p["w2"] = u(keys[2], (64, 32, 4, 4), 32 * 4 * 4)
    p["b2"] = u(keys[3], (64,), 32 * 4 * 4)
    p["w3"] = u(keys[4], (64, 64, 3, 3), 64 * 3 * 3)
    p["b3"] = u(keys[5], (64,), 64 * 3 * 3)

    h1, w1 = _conv_out_hw(h, 8, 4), _conv_out_hw(w, 8, 4)
    h2, w2_ = _conv_out_hw(h1, 4, 2), _conv_out_hw(w1, 4, 2)
    h3, w3_ = _conv_out_hw(h2, 3, 1), _conv_out_hw(w2_, 3, 1)
    conv_out = 64 * h3 * w3_

    p["fc1_w"] = u(keys[6], (512, conv_out), conv_out)     # PyTorch (out, in)
    p["fc1_b"] = u(keys[7], (512,), conv_out)
    p["fc2_w"] = u(keys[8], (n_actions, 512), 512)
    p["fc2_b"] = u(keys[9], (n_actions,), 512)
    return p


def prepare_params(raw, input_shape):
    """One-time layout prep: transpose / reorder / pad-to-128 lanes / bf16 cast."""
    c, h, w = input_shape
    prep = {}

    def conv_prep(w_oihw, b):
        O, C, k, _ = w_oihw.shape
        npad = _round_up(O, _LANE)
        # OIHW -> (kh, kw, C, O) -> (k*k*C, O): matches im2col (kh, kw, c) order.
        w2 = jnp.transpose(w_oihw, (2, 3, 1, 0)).reshape(k * k * C, O)
        w2 = jnp.pad(w2, ((0, 0), (0, npad - O))).astype(jnp.bfloat16)
        b2 = jnp.pad(b, (0, npad - O)).astype(jnp.float32)
        return w2, b2

    prep["w1"], prep["b1"] = conv_prep(raw["w1"], raw["b1"])
    prep["w2"], prep["b2"] = conv_prep(raw["w2"], raw["b2"])
    prep["w3"], prep["b3"] = conv_prep(raw["w3"], raw["b3"])

    h1, w1 = _conv_out_hw(h, 8, 4), _conv_out_hw(w, 8, 4)
    h2, w2_ = _conv_out_hw(h1, 4, 2), _conv_out_hw(w1, 4, 2)
    h3, w3_ = _conv_out_hw(h2, 3, 1), _conv_out_hw(w2_, 3, 1)

    # fc1: PyTorch (512, 64*h3*w3) with (C,H,W) flatten order  ->
    #      (h3*w3*64, 512) rows reordered for the NHWC (H,W,C) flatten used here.
    fc1 = raw["fc1_w"].reshape(512, 64, h3, w3_)
    fc1 = jnp.transpose(fc1, (2, 3, 1, 0)).reshape(h3 * w3_ * 64, 512)
    prep["fc1_w"] = fc1.astype(jnp.bfloat16)
    prep["fc1_b"] = raw["fc1_b"].astype(jnp.float32)

    n_actions = raw["fc2_w"].shape[0]
    npad2 = _round_up(n_actions, _LANE)
    fc2 = raw["fc2_w"].T                                    # (512, n_actions)
    prep["fc2_w"] = jnp.pad(
        fc2, ((0, 0), (0, npad2 - n_actions))).astype(jnp.bfloat16)
    prep["fc2_b"] = raw["fc2_b"].astype(jnp.float32)        # unpadded (keeps n_actions)
    prep["fc2_b_pad"] = jnp.pad(
        raw["fc2_b"], (0, npad2 - n_actions)).astype(jnp.float32)
    return prep


# ---------------------------------------------------------------------------
# Forward pass (matches the PyTorch module's forward semantics).
# ---------------------------------------------------------------------------
def dqn_forward(params, x_nchw):
    # NCHW -> NHWC once, and cast to bf16 up front so im2col patches (if
    # materialized) are bf16, not f32.
    x = jnp.transpose(x_nchw, (0, 2, 3, 1)).astype(jnp.bfloat16)
    c_in = x.shape[-1]

    h = conv2d_pallas(x, params["w1"], params["b1"],
                      k=8, stride=4, c_in=c_in, relu=True)   # (B,H1,W1,128)
    h = conv2d_pallas(h, params["w2"], params["b2"],
                      k=4, stride=2, c_in=32, relu=True)     # (B,H2,W2,128)
    h = conv2d_pallas(h, params["w3"], params["b3"],
                      k=3, stride=1, c_in=64, relu=True)     # (B,H3,W3,128)

    B = h.shape[0]
    flat = h[..., :64].reshape(B, -1)           # (B, H3*W3*64) in (H,W,C) order
    n_actions = params["fc2_b"].shape[0]

    if B <= 8:
        # Latency path: fc1 -> ReLU -> fc2 fused into a single pallas_call.
        q = pallas_fc_head(flat, params["fc1_w"], params["fc1_b"],
                           params["fc2_w"], params["fc2_b_pad"])
    else:
        h = pallas_linear(flat, params["fc1_w"], params["fc1_b"],
                          relu=True, out_dtype=jnp.bfloat16)     # (B, 512)
        q = pallas_linear(h, params["fc2_w"], params["fc2_b_pad"],
                          relu=False, out_dtype=jnp.float32)     # (B, 128)
    return q[:, :n_actions]


# Pure-JAX f32 reference (sanity check against the raw / PyTorch-layout params).
def dqn_forward_ref(params, x):
    def conv(x, w, b, s):
        y = jax.lax.conv_general_dilated(
            x, w, (s, s), "VALID",
            dimension_numbers=("NCHW", "OIHW", "NCHW"))
        return jax.nn.relu(y + b[None, :, None, None])
    h = conv(x, params["w1"], params["b1"], 4)
    h = conv(h, params["w2"], params["b2"], 2)
    h = conv(h, params["w3"], params["b3"], 1)
    flat = h.reshape(h.shape[0], -1)
    h = jax.nn.relu(flat @ params["fc1_w"].T + params["fc1_b"])
    return h @ params["fc2_w"].T + params["fc2_b"]


if __name__ == "__main__":
    key = jax.random.PRNGKey(0)
    k_param, k_x = jax.random.split(key)

    # Small, consistent shapes: batch=2, channels=4, spatial=36x36, 6 actions.
    # (36 -> conv1 8x8, conv2 3x3, conv3 1x1 -> conv_out_size = 64)
    input_shape = (4, 36, 36)
    n_actions = 6
    batch = 2

    raw_params = init_dqn_params(k_param, input_shape, n_actions)
    params = prepare_params(raw_params, input_shape)
    x = jax.random.normal(k_x, (batch,) + input_shape, jnp.float32)

    fwd = jax.jit(dqn_forward)
    q = fwd(params, x)
    jax.block_until_ready(q)

    assert q.shape == (batch, n_actions), q.shape

    q_ref = dqn_forward_ref(raw_params, x)
    max_err = float(jnp.max(jnp.abs(q - q_ref)))
    # bf16 matmul inputs / bf16 intermediate activations, f32 accumulation.
    assert jnp.allclose(q, q_ref, rtol=3e-2, atol=3e-2), max_err

    print("KERNEL_OK")
</pallas_src>

<mosaic_0001>
module attributes {stable_mosaic.version = 11 : i64} {
  func.func @_linear_kernel(%arg0: i32, %arg1: i32, %arg2: memref<64x256xbf16, #tpu.memory_space<vmem>>, %arg3: memref<256x128xbf16, #tpu.memory_space<vmem>>, %arg4: memref<1x128xf32, #tpu.memory_space<vmem>>, %arg5: memref<64x128xbf16, #tpu.memory_space<vmem>>) attributes {dimension_semantics = [#tpu.dimension_semantics<parallel>, #tpu.dimension_semantics<parallel>], iteration_bounds = array<i64: 2, 1>, scalar_prefetch = 0 : i64, scratch_operands = 0 : i64, tpu.core_type = #tpu.core_type<tc>, window_params = [{transform_indices = @transform_0, window_bounds = array<i64: 64, 256>}, {transform_indices = @transform_1, window_bounds = array<i64: 256, 128>}, {transform_indices = @transform_2, window_bounds = array<i64: 1, 128>}, {transform_indices = @transform_3, window_bounds = array<i64: 64, 128>}]} {
    %c0 = arith.constant 0 : index
    %c0_0 = arith.constant 0 : index
    %0 = vector.load %arg2[%c0, %c0_0] : memref<64x256xbf16, #tpu.memory_space<vmem>>, vector<64x256xbf16>
    %c0_1 = arith.constant 0 : index
    %c0_2 = arith.constant 0 : index
    %1 = vector.load %arg3[%c0_1, %c0_2] : memref<256x128xbf16, #tpu.memory_space<vmem>>, vector<256x128xbf16>
    %cst = arith.constant dense<0.000000e+00> : vector<64x128xf32>
    %2 = tpu.matmul %0, %1, %cst {dimension_numbers = #tpu.dot_dimension_numbers<[1], [0], [0], [1], [0, 0, 1, 1], [], []>} : vector<64x256xbf16>, vector<256x128xbf16>, vector<64x128xf32> -> vector<64x128xf32>
    %c0_3 = arith.constant 0 : index
    %c0_4 = arith.constant 0 : index
    %3 = vector.load %arg4[%c0_3, %c0_4] : memref<1x128xf32, #tpu.memory_space<vmem>>, vector<1x128xf32>
    %4 = vector.broadcast %3 : vector<1x128xf32> to vector<64x128xf32>
    %5 = arith.addf %2, %4 : vector<64x128xf32>
    %cst_5 = arith.constant 0.000000e+00 : f32
    %6 = vector.broadcast %cst_5 : f32 to vector<64x128xf32>
    %7 = arith.maximumf %5, %6 : vector<64x128xf32>
    %8 = arith.truncf %7 : vector<64x128xf32> to vector<64x128xbf16>
    %c0_6 = arith.constant 0 : index
    %c0_7 = arith.constant 0 : index
    %9 = vector.load %arg5[%c0_6, %c0_7] : memref<64x128xbf16, #tpu.memory_space<vmem>>, vector<64x128xbf16>
    tpu.vector_store %arg5[%c0_6, %c0_7], %8 {strides = array<i32>} : memref<64x128xbf16, #tpu.memory_space<vmem>>, vector<64x128xbf16>,
    return
  }
  func.func @transform_0(%arg0: i32, %arg1: i32) -> (i32, i32) {
    %c0_i32 = arith.constant 0 : i32
    %c0_i32_0 = arith.constant 0 : i32
    return %arg0, %c0_i32 : i32, i32
  }
  func.func @transform_1(%arg0: i32, %arg1: i32) -> (i32, i32) {
    %c0_i32 = arith.constant 0 : i32
    %c0_i32_0 = arith.constant 0 : i32
    return %c0_i32, %arg1 : i32, i32
  }
  func.func @transform_2(%arg0: i32, %arg1: i32) -> (i32, i32) {
    %c0_i32 = arith.constant 0 : i32
    %c0_i32_0 = arith.constant 0 : i32
    return %c0_i32, %arg1 : i32, i32
  }
  func.func @transform_3(%arg0: i32, %arg1: i32) -> (i32, i32) {
    %c0_i32 = arith.constant 0 : i32
    return %arg0, %arg1 : i32, i32
  }
}

module attributes {stable_mosaic.version = 11 : i64} {
  func.func @_linear_kernel(%arg0: i32, %arg1: i32, %arg2: memref<32x512xbf16, #tpu.memory_space<vmem>>, %arg3: memref<512x128xbf16, #tpu.memory_space<vmem>>, %arg4: memref<1x128xf32, #tpu.memory_space<vmem>>, %arg5: memref<32x128xbf16, #tpu.memory_space<vmem>>) attributes {dimension_semantics = [#tpu.dimension_semantics<parallel>, #tpu.dimension_semantics<parallel>], iteration_bounds = array<i64: 1, 1>, scalar_prefetch = 0 : i64, scratch_operands = 0 : i64, tpu.core_type = #tpu.core_type<tc>, window_params = [{transform_indices = @transform_0, window_bounds = array<i64: 32, 512>}, {transform_indices = @transform_1, window_bounds = array<i64: 512, 128>}, {transform_indices = @transform_2, window_bounds = array<i64: 1, 128>}, {transform_indices = @transform_3, window_bounds = array<i64: 32, 128>}]} {
    %c0 = arith.constant 0 : index
    %c0_0 = arith.constant 0 : index
    %0 = vector.load %arg2[%c0, %c0_0] : memref<32x512xbf16, #tpu.memory_space<vmem>>, vector<32x512xbf16>
    %c0_1 = arith.constant 0 : index
    %c0_2 = arith.constant 0 : index
    %1 = vector.load %arg3[%c0_1, %c0_2] : memref<512x128xbf16, #tpu.memory_space<vmem>>, vector<512x128xbf16>
    %cst = arith.constant dense<0.000000e+00> : vector<32x128xf32>
    %2 = tpu.matmul %0, %1, %cst {dimension_numbers = #tpu.dot_dimension_numbers<[1], [0], [0], [1], [0, 0, 1, 1], [], []>} : vector<32x512xbf16>, vector<512x128xbf16>, vector<32x128xf32> -> vector<32x128xf32>
    %c0_3 = arith.constant 0 : index
    %c0_4 = arith.constant 0 : index
    %3 = vector.load %arg4[%c0_3, %c0_4] : memref<1x128xf32, #tpu.memory_space<vmem>>, vector<1x128xf32>
    %4 = vector.broadcast %3 : vector<1x128xf32> to vector<32x128xf32>
    %5 = arith.addf %2, %4 : vector<32x128xf32>
    %cst_5 = arith.constant 0.000000e+00 : f32
    %6 = vector.broadcast %cst_5 : f32 to vector<32x128xf32>
    %7 = arith.maximumf %5, %6 : vector<32x128xf32>
    %8 = arith.truncf %7 : vector<32x128xf32> to vector<32x128xbf16>
    %c0_6 = arith.constant 0 : index
    %c0_7 = arith.constant 0 : index
    %9 = vector.load %arg5[%c0_6, %c0_7] : memref<32x128xbf16, #tpu.memory_space<vmem>>, vector<32x128xbf16>
    tpu.vector_store %arg5[%c0_6, %c0_7], %8 {strides = array<i32>} : memref<32x128xbf16, #tpu.memory_space<vmem>>, vector<32x128xbf16>,
    return
  }
  func.func @transform_0(%arg0: i32, %arg1: i32) -> (i32, i32) {
    %c0_i32 = arith.constant 0 : i32
    %c0_i32_0 = arith.constant 0 : i32
    return %arg0, %c0_i32 : i32, i32
  }
  func.func @transform_1(%arg0: i32, %arg1: i32) -> (i32, i32) {
    %c0_i32 = arith.constant 0 : i32
    %c0_i32_0 = arith.constant 0 : i32
    return %c0_i32, %arg1 : i32, i32
  }
  func.func @transform_2(%arg0: i32, %arg1: i32) -> (i32, i32) {
    %c0_i32 = arith.constant 0 : i32
    %c0_i32_0 = arith.constant 0 : i32
    return %c0_i32, %arg1 : i32, i32
  }
  func.func @transform_3(%arg0: i32, %arg1: i32) -> (i32, i32) {
    %c0_i32 = arith.constant 0 : i32
    return %arg0, %arg1 : i32, i32
  }
}

module attributes {stable_mosaic.version = 11 : i64} {
  func.func @_linear_kernel(%arg0: i32, %arg1: i32, %arg2: memref<16x576xbf16, #tpu.memory_space<vmem>>, %arg3: memref<576x128xbf16, #tpu.memory_space<vmem>>, %arg4: memref<1x128xf32, #tpu.memory_space<vmem>>, %arg5: memref<16x128xbf16, #tpu.memory_space<vmem>>) attributes {dimension_semantics = [#tpu.dimension_semantics<parallel>, #tpu.dimension_semantics<parallel>], iteration_bounds = array<i64: 1, 1>, scalar_prefetch = 0 : i64, scratch_operands = 0 : i64, tpu.core_type = #tpu.core_type<tc>, window_params = [{transform_indices = @transform_0, window_bounds = array<i64: 16, 576>}, {transform_indices = @transform_1, window_bounds = array<i64: 576, 128>}, {transform_indices = @transform_2, window_bounds = array<i64: 1, 128>}, {transform_indices = @transform_3, window_bounds = array<i64: 16, 128>}]} {
    %c0 = arith.constant 0 : index
    %c0_0 = arith.constant 0 : index
    %0 = vector.load %arg2[%c0, %c0_0] : memref<16x576xbf16, #tpu.memory_space<vmem>>, vector<16x576xbf16>
    %c0_1 = arith.constant 0 : index
    %c0_2 = arith.constant 0 : index
    %1 = vector.load %arg3[%c0_1, %c0_2] : memref<576x128xbf16, #tpu.memory_space<vmem>>, vector<576x128xbf16>
    %cst = arith.constant dense<0.000000e+00> : vector<16x128xf32>
    %2 = tpu.matmul %0, %1, %cst {dimension_numbers = #tpu.dot_dimension_numbers<[1], [0], [0], [1], [0, 0, 1, 1], [], []>} : vector<16x576xbf16>, vector<576x128xbf16>, vector<16x128xf32> -> vector<16x128xf32>
    %c0_3 = arith.constant 0 : index
    %c0_4 = arith.constant 0 : index
    %3 = vector.load %arg4[%c0_3, %c0_4] : memref<1x128xf32, #tpu.memory_space<vmem>>, vector<1x128xf32>
    %4 = vector.broadcast %3 : vector<1x128xf32> to vector<16x128xf32>
    %5 = arith.addf %2, %4 : vector<16x128xf32>
    %cst_5 = arith.constant 0.000000e+00 : f32
    %6 = vector.broadcast %cst_5 : f32 to vector<16x128xf32>
    %7 = arith.maximumf %5, %6 : vector<16x128xf32>
    %8 = arith.truncf %7 : vector<16x128xf32> to vector<16x128xbf16>
    %c0_6 = arith.constant 0 : index
    %c0_7 = arith.constant 0 : index
    %9 = vector.load %arg5[%c0_6, %c0_7] : memref<16x128xbf16, #tpu.memory_space<vmem>>, vector<16x128xbf16>
    tpu.vector_store %arg5[%c0_6, %c0_7], %8 {strides = array<i32>} : memref<16x128xbf16, #tpu.memory_space<vmem>>, vector<16x128xbf16>,
    return
  }
  func.func @transform_0(%arg0: i32, %arg1: i32) -> (i32, i32) {
    %c0_i32 = arith.constant 0 : i32
    %c0_i32_0 = arith.constant 0 : i32
    return %arg0, %c0_i32 : i32, i32
  }
  func.func @transform_1(%arg0: i32, %arg1: i32) -> (i32, i32) {
    %c0_i32 = arith.constant 0 : i32
    %c0_i32_0 = arith.constant 0 : i32
    return %c0_i32, %arg1 : i32, i32
  }
  func.func @transform_2(%arg0: i32, %arg1: i32) -> (i32, i32) {
    %c0_i32 = arith.constant 0 : i32
    %c0_i32_0 = arith.constant 0 : i32
    return %c0_i32, %arg1 : i32, i32
  }
  func.func @transform_3(%arg0: i32, %arg1: i32) -> (i32, i32) {
    %c0_i32 = arith.constant 0 : i32
    return %arg0, %arg1 : i32, i32
  }
}

module attributes {stable_mosaic.version = 11 : i64} {
  func.func @_fc_head_kernel(%arg0: i32, %arg1: memref<16x64xbf16, #tpu.memory_space<vmem>>, %arg2: memref<64x512xbf16, #tpu.memory_space<vmem>>, %arg3: memref<1x512xf32, #tpu.memory_space<vmem>>, %arg4: memref<512x128xbf16, #tpu.memory_space<vmem>>, %arg5: memref<1x128xf32, #tpu.memory_space<vmem>>, %arg6: memref<16x128xf32, #tpu.memory_space<vmem>>) attributes {dimension_semantics = [#tpu.dimension_semantics<parallel>], iteration_bounds = array<i64: 1>, scalar_prefetch = 0 : i64, scratch_operands = 0 : i64, tpu.core_type = #tpu.core_type<tc>, window_params = [{transform_indices = @transform_0, window_bounds = array<i64: 16, 64>}, {pipeline_mode = #tpu.pipeline_mode<synchronous>, transform_indices = @transform_1, window_bounds = array<i64: 64, 512>}, {pipeline_mode = #tpu.pipeline_mode<synchronous>, transform_indices = @transform_2, window_bounds = array<i64: 1, 512>}, {pipeline_mode = #tpu.pipeline_mode<synchronous>, transform_indices = @transform_3, window_bounds = array<i64: 512, 128>}, {pipeline_mode = #tpu.pipeline_mode<synchronous>, transform_indices = @transform_4, window_bounds = array<i64: 1, 128>}, {transform_indices = @transform_5, window_bounds = array<i64: 16, 128>}]} {
    %c0 = arith.constant 0 : index
    %c0_0 = arith.constant 0 : index
    %0 = vector.load %arg1[%c0, %c0_0] : memref<16x64xbf16, #tpu.memory_space<vmem>>, vector<16x64xbf16>
    %c0_1 = arith.constant 0 : index
    %c0_2 = arith.constant 0 : index
    %1 = vector.load %arg2[%c0_1, %c0_2] : memref<64x512xbf16, #tpu.memory_space<vmem>>, vector<64x512xbf16>
    %cst = arith.constant dense<0.000000e+00> : vector<16x512xf32>
    %2 = tpu.matmul %0, %1, %cst {dimension_numbers = #tpu.dot_dimension_numbers<[1], [0], [0], [1], [0, 0, 1, 1], [], []>} : vector<16x64xbf16>, vector<64x512xbf16>, vector<16x512xf32> -> vector<16x512xf32>
    %c0_3 = arith.constant 0 : index
    %c0_4 = arith.constant 0 : index
    %3 = vector.load %arg3[%c0_3, %c0_4] : memref<1x512xf32, #tpu.memory_space<vmem>>, vector<1x512xf32>
    %4 = vector.broadcast %3 : vector<1x512xf32> to vector<16x512xf32>
    %5 = arith.addf %2, %4 : vector<16x512xf32>
    %cst_5 = arith.constant 0.000000e+00 : f32
    %6 = vector.broadcast %cst_5 : f32 to vector<16x512xf32>
    %7 = arith.maximumf %5, %6 : vector<16x512xf32>
    %8 = arith.truncf %7 : vector<16x512xf32> to vector<16x512xbf16>
    %c0_6 = arith.constant 0 : index
    %c0_7 = arith.constant 0 : index
    %9 = vector.load %arg4[%c0_6, %c0_7] : memref<512x128xbf16, #tpu.memory_space<vmem>>, vector<512x128xbf16>
    %cst_8 = arith.constant dense<0.000000e+00> : vector<16x128xf32>
    %10 = tpu.matmul %8, %9, %cst_8 {dimension_numbers = #tpu.dot_dimension_numbers<[1], [0], [0], [1], [0, 0, 1, 1], [], []>} : vector<16x512xbf16>, vector<512x128xbf16>, vector<16x128xf32> -> vector<16x128xf32>
    %c0_9 = arith.constant 0 : index
    %c0_10 = arith.constant 0 : index
    %11 = vector.load %arg5[%c0_9, %c0_10] : memref<1x128xf32, #tpu.memory_space<vmem>>, vector<1x128xf32>
    %12 = vector.broadcast %11 : vector<1x128xf32> to vector<16x128xf32>
    %13 = arith.addf %10, %12 : vector<16x128xf32>
    %c0_11 = arith.constant 0 : index
    %c0_12 = arith.constant 0 : index
    %14 = vector.load %arg6[%c0_11, %c0_12] : memref<16x128xf32, #tpu.memory_space<vmem>>, vector<16x128xf32>
    tpu.vector_store %arg6[%c0_11, %c0_12], %13 {strides = array<i32>} : memref<16x128xf32, #tpu.memory_space<vmem>>, vector<16x128xf32>,
    return
  }
  func.func @transform_0(%arg0: i32) -> (i32, i32) {
    %c0_i32 = arith.constant 0 : i32
    %c0_i32_0 = arith.constant 0 : i32
    return %arg0, %c0_i32 : i32, i32
  }
  func.func @transform_1(%arg0: i32) -> (i32, i32) {
    %c0_i32 = arith.constant 0 : i32
    %c0_i32_0 = arith.constant 0 : i32
    %c0_i32_1 = arith.constant 0 : i32
    return %c0_i32, %c0_i32_0 : i32, i32
  }
  func.func @transform_2(%arg0: i32) -> (i32, i32) {
    %c0_i32 = arith.constant 0 : i32
    %c0_i32_0 = arith.constant 0 : i32
    %c0_i32_1 = arith.constant 0 : i32
    return %c0_i32, %c0_i32_0 : i32, i32
  }
  func.func @transform_3(%arg0: i32) -> (i32, i32) {
    %c0_i32 = arith.constant 0 : i32
    %c0_i32_0 = arith.constant 0 : i32
    %c0_i32_1 = arith.constant 0 : i32
    return %c0_i32, %c0_i32_0 : i32, i32
  }
  func.func @transform_4(%arg0: i32) -> (i32, i32) {
    %c0_i32 = arith.constant 0 : i32
    %c0_i32_0 = arith.constant 0 : i32
    %c0_i32_1 = arith.constant 0 : i32
    return %c0_i32, %c0_i32_0 : i32, i32
  }
  func.func @transform_5(%arg0: i32) -> (i32, i32) {
    %c0_i32 = arith.constant 0 : i32
    %c0_i32_0 = arith.constant 0 : i32
    return %arg0, %c0_i32 : i32, i32
  }
}

</mosaic_0001>

<bundles_post_ra>
// kernel: dqn_forward.5
= control target key start
LH: loop header
LB: loop body
LE: loop exit
PB: predicated region body
PF: predicated region fallthrough
CT: control target
= control target key end

     0   :  { %s858_s12 = smov 0   ;;  %s860_s13 = smov 0   ;;  %s956_s0 = inlined_call_operand.vmem [shape: bf16[128,256], index: 0, kind: input, shape index: {}]   ;;  %s957_s1 = inlined_call_operand.vmem [shape: bf16[256,128], index: 1, kind: input, shape index: {}]   ;;  %s958_s2 = inlined_call_operand.vmem [shape: f32[1,128], index: 2, kind: input, shape index: {}]   ;;  %s959_s3 = inlined_call_operand.vmem [shape: bf16[128,128], index: 3, kind: output, shape index: {}]  }
   0x1   :  { %s862_s14 = smov 0  }
   0x2 LB: > { %s25_s15 = sadd.s32 1, %s832_s13  ;;  %p633_p0 = scmp.ge.s32.totalorder %s836_s14, 1  ;;  %s836_s14 = sphi %s862_s14, %s13_s14   ;;  %s832_s13 = sphi %s860_s13, %s961_s13   ;;  %s828_s12 = sphi %s858_s12, %s960_s12  }
   0x3   : > { %p27_p1 = scmp.ge.s32.totalorder %s25_s15, 2  ;;  %p170_p2 = scmp.lt.s32.totalorder %s836_s14, 3 }
   0x5   : > { %s963_s15 = smov (%p27_p1, %s25_s15), 0  ;;  %p171_p3 = pnand %p633_p0, %p170_p2 }
   0x6   : > { %v786_v0 = vld [vmem:[%s957_s1 + $0x40] sm:$0xff] (!%p171_p3)   ;;  %s634_s18 = sshll.u32 (!%p171_p3), %s828_s12, 3  ;;  %v788_v2 = vld [vmem:[%s957_s1 + $0x48] sm:$0xff] (!%p171_p3)   ;;  %v790_v4 = vld [vmem:[%s957_s1 + $0x50] sm:$0xff] (!%p171_p3)  }
   0x7   : > { %174 = sbr.rel (%p171_p3) target bundleno = 272 (0x110), region = 32  ;;  %v787_v1 = vld [vmem:[%s957_s1] sm:$0xff] (!%p171_p3)   ;;  %706 = vmatprep.subr.bf16.mxu0 (!%p171_p3), %v786_v0  ;;  %746 = vmatprep.subr.bf16.mxu1 (!%p171_p3), %v786_v0  ;;  %v789_v3 = vld [vmem:[%s957_s1 + $0x8] sm:$0xff] (!%p171_p3)   ;;  %p206_p4 = scmp.lt.s32.totalorder (!%p171_p3), %s634_s18, 15  ;;  %v791_v5 = vld [vmem:[%s957_s1 + $0x10] sm:$0xff] (!%p171_p3)  }
   0x8   : > { %707 = vmatpush3.bf16.msra.mxu0 (!%p171_p3), %v787_v1  ;;  %754 = vmatpush3.bf16.msra.mxu1 (!%p171_p3), %v787_v1  ;;  %v792_v6 = vld [vmem:[%s957_s1 + $0x58] sm:$0xff] (!%p171_p3)   ;;  %v794_v8 = vld [vmem:[%s957_s1 + $0x60] sm:$0xff] (!%p171_p3)   ;;  %v796_v10 = vld [vmem:[%s957_s1 + $0x68] sm:$0xff] (!%p171_p3)  }
   0x9   : > { %708 = vmatprep.subr.bf16.mxu0 (!%p171_p3), %v788_v2  ;;  %747 = vmatprep.subr.bf16.mxu1 (!%p171_p3), %v788_v2  ;;  %v793_v7 = vld [vmem:[%s957_s1 + $0x18] sm:$0xff] (!%p171_p3)   ;;  %v795_v9 = vld [vmem:[%s957_s1 + $0x20] sm:$0xff] (!%p171_p3)   ;;  %v797_v13 = vld [vmem:[%s957_s1 + $0x28] sm:$0xff] (!%p171_p3)  }
   0xa   : > { %v798_v14 = vld [vmem:[%s957_s1 + $0x70] sm:$0xff] (!%p171_p3)   ;;  %v800_v16 = vld [vmem:[%s957_s1 + $0x78] sm:$0xff] (!%p171_p3)   ;;  %v639_v26 = vld [vmem:[%s958_s2] ss:$0 sm:$0xff] (!%p171_p3) }
   0xb   : > { %v799_v15 = vld [vmem:[%s957_s1 + $0x30] sm:$0xff] (!%p171_p3)   ;;  %v801_v17 = vld [vmem:[%s957_s1 + $0x38] sm:$0xff] (!%p171_p3)  }
   0xc   : > { %709 = vmatpush3.bf16.msra.mxu0 (!%p171_p3), %v789_v3  ;;  %755 = vmatpush3.bf16.msra.mxu1 (!%p171_p3), %v789_v3 }
   0xd   : > { %710 = vmatprep.subr.bf16.mxu0 (!%p171_p3), %v790_v4  ;;  %748 = vmatprep.subr.bf16.mxu1 (!%p171_p3), %v790_v4 }
   0xe   : > { %s965_s18 = smov (!%p206_p4, %s634_s18), 15 }
   0xf   : > { %s674_s6 = sshll.u32 %s965_s18, 3  ;;  %s638_s5 = sshll.u32 %s965_s18, 2 }
  0x10   : > { %711 = vmatpush3.bf16.msra.mxu0 %v791_v5  ;;  %756 = vmatpush3.bf16.msra.mxu1 %v791_v5  ;;  %s909_s11 = scalar_lea.vmem %s956_s0, %s674_s6  ;;  %s226_s8 = scalar_lea.vmem %s959_s3, %s638_s5 }
  0x11   : > { %712 = vmatprep.subr.bf16.mxu0 %v792_v6  ;;  %749 = vmatprep.subr.bf16.mxu1 %v792_v6  ;;  %v804_v11 = vld [vmem:[%s909_s11 + $0x4] ss:$8 sps:$4 sm:$0xff]   ;;  %v802_v18 = vld [vmem:[%s909_s11] ss:$8 sps:$4 sm:$0xff]   ;;  %v808_v20 = vld [vmem:[%s909_s11 + $0x14] ss:$8 sps:$4 sm:$0xff]  }
  0x12   : > { %v807_v12 = vld [vmem:[%s909_s11 + $0x24] ss:$8 sps:$4 sm:$0xff]   ;;  %444 = vmatprep.mubr.bf16.mxu0 %v804_v11  ;;  %v805_v19 = vld [vmem:[%s909_s11 + $0x20] ss:$8 sps:$4 sm:$0xff]   ;;  %v810_v21 = vld [vmem:[%s909_s11 + $0x34] ss:$8 sps:$4 sm:$0xff]  }
  0x13   : > { %460 = vmatprep.mubr.bf16.mxu1 %v807_v12  ;;  %v812_v22 = vld [vmem:[%s909_s11 + $0x10] ss:$8 sps:$4 sm:$0xff]  }
  0x14   : > { %713 = vmatpush3.bf16.msra.mxu0 %v793_v7  ;;  %757 = vmatpush3.bf16.msra.mxu1 %v793_v7  ;;  %v813_v23 = vld [vmem:[%s909_s11 + $0x30] ss:$8 sps:$4 sm:$0xff]  }
  0x15   : > { %714 = vmatprep.subr.bf16.mxu0 %v794_v8  ;;  %750 = vmatprep.subr.bf16.mxu1 %v794_v8 }
  0x18   : > { %715 = vmatpush3.bf16.msra.mxu0 %v795_v9  ;;  %758 = vmatpush3.bf16.msra.mxu1 %v795_v9 }
  0x19   : > { %716 = vmatprep.subr.bf16.mxu0 %v796_v10  ;;  %751 = vmatprep.subr.bf16.mxu1 %v796_v10 }
  0x1c   : > { %717 = vmatpush3.bf16.msra.mxu0 %v797_v13  ;;  %759 = vmatpush3.bf16.msra.mxu1 %v797_v13 }
  0x1d   : > { %718 = vmatprep.subr.bf16.mxu0 %v798_v14  ;;  %752 = vmatprep.subr.bf16.mxu1 %v798_v14 }
  0x20   : > { %719 = vmatpush3.bf16.msra.mxu0 %v799_v15  ;;  %760 = vmatpush3.bf16.msra.mxu1 %v799_v15 }
  0x21   : > { %720 = vmatprep.subr.bf16.mxu0 %v800_v16  ;;  %753 = vmatprep.subr.bf16.mxu1 %v800_v16 }
  0x24   : > { %721 = vmatpush3.bf16.msra.mxu0 %v801_v17  ;;  %761 = vmatpush3.bf16.msra.mxu1 %v801_v17 }
  0x27   : > { %445 = vmatmul.mubr.bf16.vlgmr.msra.gmra.mrb[0].mxu0 %v802_v18  ;;  %461 = vmatmul.mubr.bf16.vlgmr.msra.gmra.mrb[0].mxu1 %v805_v19 }
  0x28   : > { %452 = vmatprep.mubr.bf16.mxu0 %v808_v20  ;;  %468 = vmatprep.mubr.bf16.mxu1 %v810_v21 }
  0x2f   : > { %453 = vmatmul.mubr.bf16.gmra.mrb[4].mxu0 %v812_v22  ;;  %469 = vmatmul.mubr.bf16.gmra.mrb[4].mxu1 %v813_v23 }
  0xfa   : > { %v722_v24 = vpop.f32.mrb[0].mxu0  ;;  %v734_v25 = vpop.f32.mrb[0].mxu1 }
  0xfb   : > { %v723_v27 = vpop.f32.mrb[1].mxu0  ;;  %v735_v28 = vpop.f32.mrb[1].mxu1 }
  0xfc   : > { %v724_v29 = vadd.f32 %v723_v27, %v722_v24  ;;  %v736_v30 = vadd.f32 %v735_v28, %v734_v25  ;;  %v725_v31 = vpop.f32.mrb[2].mxu0  ;;  %v737_v32 = vpop.f32.mrb[2].mxu1 }
  0xfd   : > { %v726_v33 = vpop.f32.mrb[3].mxu0  ;;  %v738_v34 = vpop.f32.mrb[3].mxu1 }
  0xfe   : > { %v447_v35 = vadd.f32 %v724_v29, %v639_v26  ;;  %v463_v36 = vadd.f32 %v736_v30, %v639_v26  ;;  %v727_v37 = vadd.f32 %v726_v33, %v725_v31  ;;  %v739_v38 = vadd.f32 %v738_v34, %v737_v32 }
 0x100   : > { %v450_v39 = vadd.f32 %v727_v37, %v639_v26  ;;  %v466_v40 = vadd.f32 %v739_v38, %v639_v26  ;;  %v477_v41 = vmax.f32 %v447_v35, 0.0  ;;  %v481_v42 = vmax.f32 %v463_v36, 0.0 }
 0x102   : > { %v478_v43 = vmax.f32 %v450_v39, 0.0  ;;  %v482_v44 = vmax.f32 %v466_v40, 0.0  ;;  %v728_v45 = vpop.f32.mrb[4].mxu0  ;;  %v740_v46 = vpop.f32.mrb[4].mxu1 }
 0x103   : > { %v729_v47 = vpop.f32.mrb[5].mxu0  ;;  %v741_v48 = vpop.f32.mrb[5].mxu1 }
 0x104   : > { %v686_v49 = vpack.c.bf16 %v478_v43, %v477_v41  ;;  %v696_v50 = vpack.c.bf16 %v482_v44, %v481_v42  ;;  %v730_v51 = vadd.f32 %v729_v47, %v728_v45  ;;  %v742_v52 = vadd.f32 %v741_v48, %v740_v46  ;;  %v731_v53 = vpop.f32.mrb[6].mxu0  ;;  %v743_v54 = vpop.f32.mrb[6].mxu1 }
 0x105   : > { %v732_v55 = vpop.f32.mrb[7].mxu0  ;;  %v744_v56 = vpop.f32.mrb[7].mxu1 }
 0x106   : > { %687 = vst [vmem:[%s226_s8] sm:$0xff] %v686_v49   ;;  %704 = vst [vmem:[%s226_s8 + $0x10] sm:$0xff] %v696_v50   ;;  %v455_v57 = vadd.f32 %v730_v51, %v639_v26  ;;  %v471_v58 = vadd.f32 %v742_v52, %v639_v26  ;;  %v733_v59 = vadd.f32 %v732_v55, %v731_v53 }
 0x107   : > { %v745_v60 = vadd.f32 %v744_v56, %v743_v54 }
 0x108   : > { %v458_v61 = vadd.f32 %v733_v59, %v639_v26  ;;  %v479_v63 = vmax.f32 %v455_v57, 0.0  ;;  %v483_v0 = vmax.f32 %v471_v58, 0.0 }
 0x109   : > { %v474_v62 = vadd.f32 %v745_v60, %v639_v26 }
 0x10a   : > { %v480_v1 = vmax.f32 %v458_v61, 0.0 }
 0x10b   : > { %v484_v2 = vmax.f32 %v474_v62, 0.0 }
 0x10c   : > { %v691_v3 = vpack.c.bf16 %v480_v1, %v479_v63 }
 0x10d   : > { %v701_v4 = vpack.c.bf16 %v484_v2, %v483_v0 }
 0x10e   : > { %703 = vst [vmem:[%s226_s8 + $0x8] sm:$0xff] %v691_v3  }
 0x10f   : > { %705 = vst [vmem:[%s226_s8 + $0x18] sm:$0xff] %v701_v4  }
 0x110 PF: > { %s13_s14 = sadd.s32 1, %s836_s14   ;;  %s960_s12 = smov %s832_s13 }
 0x111   : > { %p10_p5 = scmp.ge.s32.totalorder %s13_s14, 4   ;;  %s961_s13 = smov %s963_s15 }
 0x113   :  { %12 = sbr.rel (!%p10_p5) target bundleno = 2 (0x2), region = 68 }

// kernel: dqn_forward.6
= control target key start
LH: loop header
LB: loop body
LE: loop exit
PB: predicated region body
PF: predicated region fallthrough
CT: control target
= control target key end

     0   :  { %s812_s0 = inlined_call_operand.vmem [shape: bf16[18,512], index: 0, kind: input, shape index: {}]   ;;  %s813_s1 = inlined_call_operand.vmem [shape: bf16[512,128], index: 1, kind: input, shape index: {}]   ;;  %s814_s2 = inlined_call_operand.vmem [shape: f32[1,128], index: 2, kind: input, shape index: {}]   ;;  %s815_s3 = inlined_call_operand.vmem [shape: bf16[18,128], index: 3, kind: output, shape index: {}]  }
   0x1   :  { %v619_v0 = vld [vmem:[%s813_s1 + $0x40] sm:$0xff]   ;;  %v623_v4 = vld [vmem:[%s813_s1 + $0x48] sm:$0xff]   ;;  %v627_v8 = vld [vmem:[%s813_s1 + $0x50] sm:$0xff]  }
   0x2   :  { %v620_v1 = vld [vmem:[%s813_s1 + $0xc0] sm:$0xff]   ;;  %563 = vmatprep.subr.bf16.mxu0 %v619_v0  ;;  %v624_v5 = vld [vmem:[%s813_s1 + $0xc8] sm:$0xff]   ;;  %v628_v9 = vld [vmem:[%s813_s1 + $0xd0] sm:$0xff]  }
   0x3   :  { %v621_v2 = vld [vmem:[%s813_s1] sm:$0xff]   ;;  %591 = vmatprep.subr.bf16.mxu1 %v620_v1  ;;  %v625_v6 = vld [vmem:[%s813_s1 + $0x8] sm:$0xff]   ;;  %v629_v10 = vld [vmem:[%s813_s1 + $0x10] sm:$0xff]  }
   0x4   :  { %v622_v3 = vld [vmem:[%s813_s1 + $0x80] sm:$0xff]   ;;  %564 = vmatpush3.bf16.msra.mxu0 %v621_v2  ;;  %v626_v7 = vld [vmem:[%s813_s1 + $0x88] sm:$0xff]   ;;  %v630_v11 = vld [vmem:[%s813_s1 + $0x90] sm:$0xff]  }
   0x5   :  { %592 = vmatpush3.bf16.msra.mxu1 %v622_v3  ;;  %565 = vmatprep.subr.bf16.mxu0 %v623_v4  ;;  %v631_v12 = vld [vmem:[%s813_s1 + $0x58] sm:$0xff]   ;;  %v635_v16 = vld [vmem:[%s813_s1 + $0x60] sm:$0xff]   ;;  %v639_v20 = vld [vmem:[%s813_s1 + $0x68] sm:$0xff]  }
   0x6   :  { %593 = vmatprep.subr.bf16.mxu1 %v624_v5  ;;  %v632_v13 = vld [vmem:[%s813_s1 + $0xd8] sm:$0xff]   ;;  %v636_v17 = vld [vmem:[%s813_s1 + $0xe0] sm:$0xff]   ;;  %v640_v21 = vld [vmem:[%s813_s1 + $0xe8] sm:$0xff]  }
   0x7   :  { %v633_v14 = vld [vmem:[%s813_s1 + $0x18] sm:$0xff]   ;;  %v637_v18 = vld [vmem:[%s813_s1 + $0x20] sm:$0xff]   ;;  %v641_v22 = vld [vmem:[%s813_s1 + $0x28] sm:$0xff]  }
   0x8   :  { %566 = vmatpush3.bf16.msra.mxu0 %v625_v6  ;;  %v634_v15 = vld [vmem:[%s813_s1 + $0x98] sm:$0xff]   ;;  %v638_v19 = vld [vmem:[%s813_s1 + $0xa0] sm:$0xff]   ;;  %v642_v23 = vld [vmem:[%s813_s1 + $0xa8] sm:$0xff]  }
   0x9   :  { %594 = vmatpush3.bf16.msra.mxu1 %v626_v7  ;;  %567 = vmatprep.subr.bf16.mxu0 %v627_v8  ;;  %v643_v24 = vld [vmem:[%s813_s1 + $0x70] sm:$0xff]   ;;  %v647_v28 = vld [vmem:[%s813_s1 + $0x78] sm:$0xff]   ;;  %v503_v42 = vld [vmem:[%s814_s2] ss:$0 sm:$0xff] }
   0xa   :  { %595 = vmatprep.subr.bf16.mxu1 %v628_v9  ;;  %v644_v25 = vld [vmem:[%s813_s1 + $0xf0] sm:$0xff]   ;;  %v648_v29 = vld [vmem:[%s813_s1 + $0xf8] sm:$0xff]  }
   0xb   :  { %v645_v26 = vld [vmem:[%s813_s1 + $0x30] sm:$0xff]   ;;  %v649_v30 = vld [vmem:[%s813_s1 + $0x38] sm:$0xff]  }
   0xc   :  { %568 = vmatpush3.bf16.msra.mxu0 %v629_v10  ;;  %v646_v27 = vld [vmem:[%s813_s1 + $0xb0] sm:$0xff]   ;;  %v650_v31 = vld [vmem:[%s813_s1 + $0xb8] sm:$0xff]  }
   0xd   :  { %596 = vmatpush3.bf16.msra.mxu1 %v630_v11  ;;  %569 = vmatprep.subr.bf16.mxu0 %v631_v12  ;;  %v651_v32 = vld [vmem:[%s812_s0] ss:$16 sps:$4 sm:$0xff]   ;;  %v653_v33 = vld [vmem:[%s812_s0 + $0x4] ss:$16 sps:$4 sm:$0xff]   ;;  %v654_v34 = vld [vmem:[%s812_s0 + $0x8] ss:$16 sps:$4 sm:$0xff]  }
   0xe   :  { %597 = vmatprep.subr.bf16.mxu1 %v632_v13  ;;  %v656_v35 = vld [vmem:[%s812_s0 + $0xc] ss:$16 sps:$4 sm:$0xff]   ;;  %358 = vmatprep.mubr.bf16.mxu0 %v653_v33  ;;  %v657_v36 = vld [vmem:[%s812_s0 + $0x24] ss:$16 sps:$4 sm:$0xff]   ;;  %v661_v38 = vld [vmem:[%s812_s0 + $0x20] ss:$16 sps:$4 sm:$0xff]  }
   0xf   :  { %407 = vmatprep.mubr.bf16.mxu1 %v656_v35  ;;  %v659_v37 = vld [vmem:[%s812_s0 + $0x2c] ss:$16 sps:$4 sm:$0xff]   ;;  %v662_v39 = vld [vmem:[%s812_s0 + $0x28] ss:$16 sps:$4 sm:$0xff]  }
  0x10   :  { %570 = vmatpush3.bf16.msra.mxu0 %v633_v14 }
  0x11   :  { %598 = vmatpush3.bf16.msra.mxu1 %v634_v15  ;;  %571 = vmatprep.subr.bf16.mxu0 %v635_v16 }
  0x12   :  { %599 = vmatprep.subr.bf16.mxu1 %v636_v17 }
  0x14   :  { %572 = vmatpush3.bf16.msra.mxu0 %v637_v18 }
  0x15   :  { %600 = vmatpush3.bf16.msra.mxu1 %v638_v19  ;;  %573 = vmatprep.subr.bf16.mxu0 %v639_v20 }
  0x16   :  { %601 = vmatprep.subr.bf16.mxu1 %v640_v21 }
  0x18   :  { %574 = vmatpush3.bf16.msra.mxu0 %v641_v22 }
  0x19   :  { %602 = vmatpush3.bf16.msra.mxu1 %v642_v23  ;;  %575 = vmatprep.subr.bf16.mxu0 %v643_v24 }
  0x1a   :  { %603 = vmatprep.subr.bf16.mxu1 %v644_v25 }
  0x1c   :  { %576 = vmatpush3.bf16.msra.mxu0 %v645_v26 }
  0x1d   :  { %604 = vmatpush3.bf16.msra.mxu1 %v646_v27  ;;  %577 = vmatprep.subr.bf16.mxu0 %v647_v28 }
  0x1e   :  { %605 = vmatprep.subr.bf16.mxu1 %v648_v29 }
  0x20   :  { %578 = vmatpush3.bf16.msra.mxu0 %v649_v30 }
  0x21   :  { %606 = vmatpush3.bf16.msra.mxu1 %v650_v31 }
  0x23   :  { %359 = vmatmul.mubr.bf16.vlgmr.msra.gmra.mrb[0].mxu0 %v651_v32 }
  0x24   :  { %408 = vmatmul.mubr.bf16.vlgmr.msra.gmra.mrb[0].mxu1 %v654_v34  ;;  %366 = vmatprep.mubr.bf16.mxu0 %v657_v36 }
  0x25   :  { %415 = vmatprep.mubr.bf16.mxu1 %v659_v37 }
  0x2b   :  { %367 = vmatmul.mubr.bf16.gmra.mrb[4].mxu0 %v661_v38 }
  0x2c   :  { %416 = vmatmul.mubr.bf16.gmra.mrb[4].mxu1 %v662_v39 }
  0xf6   :  { %v579_v40 = vpop.f32.mrb[0].mxu0 }
  0xf7   :  { %v607_v41 = vpop.f32.mrb[0].mxu1  ;;  %v580_v43 = vpop.f32.mrb[1].mxu0 }
  0xf8   :  { %v581_v44 = vadd.f32 %v580_v43, %v579_v40  ;;  %v608_v45 = vpop.f32.mrb[1].mxu1  ;;  %v582_v46 = vpop.f32.mrb[2].mxu0 }
  0xf9   :  { %v609_v47 = vadd.f32 %v608_v45, %v607_v41  ;;  %v610_v48 = vpop.f32.mrb[2].mxu1  ;;  %v583_v49 = vpop.f32.mrb[3].mxu0 }
  0xfa   :  { %v361_v50 = vadd.f32 %v581_v44, %v503_v42  ;;  %v584_v51 = vadd.f32 %v583_v49, %v582_v46  ;;  %v611_v52 = vpop.f32.mrb[3].mxu1 }
  0xfb   :  { %v612_v53 = vadd.f32 %v611_v52, %v610_v48 }
  0xfc   :  { %v410_v54 = vadd.f32 %v609_v47, %v361_v50  ;;  %v364_v55 = vadd.f32 %v584_v51, %v503_v42 }
  0xfe   :  { %v413_v56 = vadd.f32 %v612_v53, %v364_v55  ;;  %v585_v57 = vpop.f32.mrb[4].mxu0  ;;  %v424_v60 = vmax.f32 %v410_v54, 0.0 }
  0xff   :  { %v613_v58 = vpop.f32.mrb[4].mxu1  ;;  %v586_v59 = vpop.f32.mrb[5].mxu0 }
 0x100   :  { %v425_v61 = vmax.f32 %v413_v56, 0.0  ;;  %v587_v62 = vadd.f32 %v586_v59, %v585_v57  ;;  %v614_v63 = vpop.f32.mrb[5].mxu1  ;;  %v588_v0 = vpop.f32.mrb[6].mxu0 }
 0x101   :  { %v615_v1 = vadd.f32 %v614_v63, %v613_v58  ;;  %v616_v2 = vpop.f32.mrb[6].mxu1  ;;  %v589_v3 = vpop.f32.mrb[7].mxu0 }
 0x102   :  { %v555_v4 = vpack.c.bf16 %v425_v61, %v424_v60  ;;  %v369_v5 = vadd.f32 %v587_v62, %v503_v42  ;;  %v590_v6 = vadd.f32 %v589_v3, %v588_v0  ;;  %v617_v7 = vpop.f32.mrb[7].mxu1 }
 0x103   :  { %v618_v8 = vadd.f32 %v617_v7, %v616_v2 }
 0x104   :  { %556 = vst [vmem:[#allocation2] sm:$0xff] %v555_v4   ;;  %v418_v9 = vadd.f32 %v615_v1, %v369_v5  ;;  %v372_v10 = vadd.f32 %v590_v6, %v503_v42 }
 0x106   :  { %v421_v11 = vadd.f32 %v618_v8, %v372_v10  ;;  %v426_v12 = vmax.f32 %v418_v9, 0.0 }
 0x108   :  { %v427_v13 = vmax.f32 %v421_v11, 0.0 }
 0x10a   :  { %v560_v14 = vpack.c.bf16 %v427_v13, %v426_v12 }
 0x10b   :  { %v465_v15 = vld [vmem:[#allocation2] sm:$0xff]  }
 0x10c   :  { %466 = vst [vmem:[%s815_s3] sm:$0xff] %v465_v15   ;;  %562 = vst [vmem:[#allocation2 + $0x8] sm:$0xff] %v560_v14  }
 0x113   :  { %v469_v16 = vld [vmem:[#allocation2 + $0x8] sm:$0xf] }
 0x114   :  { %470 = vst [vmem:[%s815_s3 + $0x8] sm:$0xf] %v469_v16 }

// kernel: dqn_forward.8
= control target key start
LH: loop header
LB: loop body
LE: loop exit
PB: predicated region body
PF: predicated region fallthrough
CT: control target
= control target key end

     0   :  { %v1000_v3 = vmov 0.0|0.0   ;;  %v1001_v40 = vmov 0.0   ;;  %v279_v43 = vlaneseq  ;;  %v1002_v52 = vmov 1966171168   ;;  %s1180_s0 = inlined_call_operand.vmem [shape: bf16[576,128], index: 0, kind: input, shape index: {}]   ;;  %s1181_s1 = inlined_call_operand.vmem [shape: f32[1,128], index: 1, kind: input, shape index: {}]   ;;  %s1182_s2 = inlined_call_operand.vmem [shape: bf16[2,1,1,576], index: 2, kind: input, shape index: {}]   ;;  %s1183_s3 = inlined_call_operand.vmem [shape: bf16[2,128], index: 3, kind: output, shape index: {}]  }
   0x1   :  { %v952_v0 = vld [vmem:[%s1180_s0 + $0x40] sm:$0xff]   ;;  %69 = vst [vmem:[#allocation3 + $0x5] sm:$0x1] %v1000_v3  ;;  %72 = vst [vmem:[#allocation3 + $0x6] sm:$0x1] %v1000_v3  ;;  %v956_v5 = vld [vmem:[%s1180_s0 + $0x48] sm:$0xff]   ;;  %v277_v53 = vunpack.c.l.s4 %v1002_v52 }
   0x2   :  { %v953_v1 = vld [vmem:[%s1180_s0] sm:$0xff]   ;;  %887 = vmatprep.subr.bf16.mxu0 %v952_v0  ;;  %75 = vst [vmem:[#allocation3 + $0x7] sm:$0x1] %v1000_v3  ;;  %78 = vst [vmem:[#allocation3 + $0x8] sm:$0x1] %v1000_v3  ;;  %v957_v6 = vld [vmem:[%s1180_s0 + $0x8] sm:$0xff]  }
   0x3   :  { %v954_v2 = vld [vmem:[%s1180_s0 + $0xc0] sm:$0xff]   ;;  %81 = vst [vmem:[#allocation3 + $0x9] sm:$0x1] %v1000_v3  ;;  %84 = vst [vmem:[#allocation3 + $0xa] sm:$0x1] %v1000_v3  ;;  %888 = vmatpush3.bf16.msra.mxu0 %v953_v1  ;;  %v958_v7 = vld [vmem:[%s1180_s0 + $0xc8] sm:$0xff]   ;;  %v278_v55 = vunpack.c.0.s8 %v277_v53 }
   0x4   :  { %87 = vst [vmem:[#allocation3 + $0xb] sm:$0x1] %v1000_v3  ;;  %90 = vst [vmem:[#allocation3 + $0xc] sm:$0x1] %v1000_v3  ;;  %v955_v4 = vld [vmem:[%s1180_s0 + $0x80] sm:$0xff]   ;;  %909 = vmatprep.subr.bf16.mxu1 %v954_v2  ;;  %889 = vmatprep.subr.bf16.mxu0 %v956_v5  ;;  %v959_v8 = vld [vmem:[%s1180_s0 + $0x88] sm:$0xff]  }
   0x5   :  { %93 = vst [vmem:[#allocation3 + $0xd] sm:$0x1] %v1000_v3  ;;  %96 = vst [vmem:[#allocation3 + $0xe] sm:$0x1] %v1000_v3  ;;  %910 = vmatpush3.bf16.msra.mxu1 %v955_v4  ;;  %v960_v9 = vld [vmem:[%s1180_s0 + $0x50] sm:$0xff]   ;;  %v964_v13 = vld [vmem:[%s1180_s0 + $0x58] sm:$0xff]  }
   0x6   :  { %99 = vst [vmem:[#allocation3 + $0xf] sm:$0x1] %v1000_v3  ;;  %102 = vst [vmem:[#allocation3 + $0x10] sm:$0x1] %v1000_v3  ;;  %911 = vmatprep.subr.bf16.mxu1 %v958_v7  ;;  %v961_v10 = vld [vmem:[%s1180_s0 + $0x10] sm:$0xff]   ;;  %v965_v14 = vld [vmem:[%s1180_s0 + $0x18] sm:$0xff]  }
   0x7   :  { %105 = vst [vmem:[#allocation3 + $0x11] sm:$0x1] %v1000_v3  ;;  %108 = vst [vmem:[#allocation3 + $0x12] sm:$0x1] %v1000_v3  ;;  %890 = vmatpush3.bf16.msra.mxu0 %v957_v6  ;;  %v962_v11 = vld [vmem:[%s1180_s0 + $0xd0] sm:$0xff]   ;;  %v966_v15 = vld [vmem:[%s1180_s0 + $0xd8] sm:$0xff]  }
   0x8   :  { %111 = vst [vmem:[#allocation3 + $0x13] sm:$0x1] %v1000_v3  ;;  %114 = vst [vmem:[#allocation3 + $0x14] sm:$0x1] %v1000_v3  ;;  %891 = vmatprep.subr.bf16.mxu0 %v960_v9  ;;  %v963_v12 = vld [vmem:[%s1180_s0 + $0x90] sm:$0xff]   ;;  %v967_v16 = vld [vmem:[%s1180_s0 + $0x98] sm:$0xff]  }
   0x9   :  { %117 = vst [vmem:[#allocation3 + $0x15] sm:$0x1] %v1000_v3  ;;  %120 = vst [vmem:[#allocation3 + $0x16] sm:$0x1] %v1000_v3  ;;  %912 = vmatpush3.bf16.msra.mxu1 %v959_v8  ;;  %v968_v17 = vld [vmem:[%s1180_s0 + $0x60] sm:$0xff]   ;;  %v972_v21 = vld [vmem:[%s1180_s0 + $0x68] sm:$0xff]  }
   0xa   :  { %123 = vst [vmem:[#allocation3 + $0x17] sm:$0x1] %v1000_v3  ;;  %126 = vst [vmem:[#allocation3 + $0x18] sm:$0x1] %v1000_v3  ;;  %913 = vmatprep.subr.bf16.mxu1 %v962_v11  ;;  %v969_v18 = vld [vmem:[%s1180_s0 + $0x20] sm:$0xff]   ;;  %v973_v22 = vld [vmem:[%s1180_s0 + $0x28] sm:$0xff]  }
   0xb   :  { %129 = vst [vmem:[#allocation3 + $0x19] sm:$0x1] %v1000_v3  ;;  %132 = vst [vmem:[#allocation3 + $0x1a] sm:$0x1] %v1000_v3  ;;  %892 = vmatpush3.bf16.msra.mxu0 %v961_v10  ;;  %v970_v19 = vld [vmem:[%s1180_s0 + $0xe0] sm:$0xff]   ;;  %v974_v23 = vld [vmem:[%s1180_s0 + $0xe8] sm:$0xff]  }
   0xc   :  { %135 = vst [vmem:[#allocation3 + $0x1b] sm:$0x1] %v1000_v3  ;;  %138 = vst [vmem:[#allocation3 + $0x1c] sm:$0x1] %v1000_v3  ;;  %893 = vmatprep.subr.bf16.mxu0 %v964_v13  ;;  %v971_v20 = vld [vmem:[%s1180_s0 + $0xa0] sm:$0xff]   ;;  %v975_v24 = vld [vmem:[%s1180_s0 + $0xa8] sm:$0xff]  }
   0xd   :  { %141 = vst [vmem:[#allocation3 + $0x1d] sm:$0x1] %v1000_v3  ;;  %144 = vst [vmem:[#allocation3 + $0x1e] sm:$0x1] %v1000_v3  ;;  %914 = vmatpush3.bf16.msra.mxu1 %v963_v12  ;;  %v976_v25 = vld [vmem:[%s1180_s0 + $0x70] sm:$0xff]   ;;  %v980_v29 = vld [vmem:[%s1180_s0 + $0x78] sm:$0xff]  }
   0xe   :  { %147 = vst [vmem:[#allocation3 + $0x1f] sm:$0x1] %v1000_v3  ;;  %150 = vst [vmem:[#allocation3 + $0x20] sm:$0x1] %v1000_v3  ;;  %915 = vmatprep.subr.bf16.mxu1 %v966_v15  ;;  %v977_v26 = vld [vmem:[%s1180_s0 + $0x30] sm:$0xff]   ;;  %v981_v30 = vld [vmem:[%s1180_s0 + $0x38] sm:$0xff]  }
   0xf   :  { %153 = vst [vmem:[#allocation3 + $0x21] sm:$0x1] %v1000_v3  ;;  %156 = vst [vmem:[#allocation3 + $0x22] sm:$0x1] %v1000_v3  ;;  %894 = vmatpush3.bf16.msra.mxu0 %v965_v14  ;;  %v978_v27 = vld [vmem:[%s1180_s0 + $0xf0] sm:$0xff]   ;;  %v982_v31 = vld [vmem:[%s1180_s0 + $0xf8] sm:$0xff]  }
  0x10   :  { %159 = vst [vmem:[#allocation3 + $0x23] sm:$0x1] %v1000_v3  ;;  %162 = vst [vmem:[#allocation3 + $0x24] sm:$0x1] %v1000_v3  ;;  %895 = vmatprep.subr.bf16.mxu0 %v968_v17  ;;  %v979_v28 = vld [vmem:[%s1180_s0 + $0xb0] sm:$0xff]   ;;  %v995_v49 = vld [vmem:[%s1180_s0 + $0xb8] sm:$0xff]  }
  0x11   :  { %165 = vst [vmem:[#allocation3 + $0x25] sm:$0x1] %v1000_v3  ;;  %168 = vst [vmem:[#allocation3 + $0x26] sm:$0x1] %v1000_v3  ;;  %916 = vmatpush3.bf16.msra.mxu1 %v967_v16  ;;  %v17_v32 = vld [vmem:[%s1182_s2] sm:$0x1] }
  0x12   :  { %171 = vst [vmem:[#allocation3 + $0x27] sm:$0x1] %v1000_v3  ;;  %917 = vmatprep.subr.bf16.mxu1 %v970_v19  ;;  %v840_v33 = vld [vmem:[%s1182_s2 + $0x1] sm:$0x1]  ;;  %v841_v34 = vld [vmem:[%s1182_s2 + $0x2] sm:$0x1]  ;;  %v18_v35 = vunpack.c.l.bf16 %v17_v32 }
  0x13   :  { %896 = vmatpush3.bf16.msra.mxu0 %v969_v18  ;;  %v28_v36 = vunpack.c.l.bf16 %v840_v33  ;;  %v39_v37 = vunpack.c.l.bf16 %v841_v34  ;;  %v842_v38 = vld [vmem:[%s1182_s2 + $0x3] sm:$0x1]  ;;  %v843_v39 = vld [vmem:[%s1182_s2 + $0x4] sm:$0x1]  ;;  %v280_v50 = vshrl.u32 %v279_v43, 7  ;;  %vm1003_vm0 = vmmov 0  }
  0x14   :  { %897 = vmatprep.subr.bf16.mxu0 %v972_v21  ;;  %v50_v41 = vunpack.c.l.bf16 %v842_v38  ;;  %v61_v42 = vunpack.c.l.bf16 %v843_v39  ;;  %v20_v44 = vpack.c.bf16 %v1001_v40, %v18_v35  ;;  %v986_v51 = vld [vmem:[#allocation3 + $0xa] ss:$5 sps:$4 sm:$0xff]   ;;  %v989_v54 = vld [vmem:[#allocation3 + $0x14] ss:$5 sps:$4 sm:$0xff]   ;;  %vm605_vm1 = vcmask 523264  }
  0x15   :  { %918 = vmatpush3.bf16.msra.mxu1 %v971_v20  ;;  %v31_v45 = vpack.c.bf16 %v1001_v40, %v28_v36  ;;  %v42_v46 = vpack.c.bf16 %v1001_v40, %v39_v37  ;;  %v1141_v57 = vsub.s32 %v278_v55, %v280_v50  ;;  %v988_v3 = vld [vmem:[#allocation3 + $0xe] ss:$5 sps:$4 sm:$0x11]   ;;  %v991_v4 = vld [vmem:[#allocation3 + $0x18] ss:$5 sps:$4 sm:$0x11]  }
  0x16   :  { %919 = vmatprep.subr.bf16.mxu1 %v974_v23  ;;  %v53_v47 = vpack.c.bf16 %v1001_v40, %v50_v41  ;;  %v64_v48 = vpack.c.bf16 %v1001_v40, %v61_v42  ;;  %22 = vst [vmem:[#allocation3] sm:$0x1] %v20_v44  ;;  %v996_v13 = vld [vmem:[%s1180_s0 + $0x100] sm:$0xff]   ;;  %v997_v20 = vld [vmem:[%s1180_s0 + $0x108] sm:$0xff]   ;;  %v998_v23 = vld [vmem:[%s1180_s0 + $0x110] sm:$0xff]  }
  0x17   :  { %898 = vmatpush3.bf16.msra.mxu0 %v973_v22  ;;  %33 = vst [vmem:[#allocation3 + $0x1] sm:$0x1] %v31_v45  ;;  %44 = vst [vmem:[#allocation3 + $0x2] sm:$0x1] %v42_v46  ;;  %v296_v59 = vrot.slane %v986_v51, %v1141_v57  ;;  %v310_v60 = vrot.slane %v989_v54, %v1141_v57  ;;  %v303_v16 = vrot.slane %v988_v3, %v1141_v57 }
  0x18   :  { %899 = vmatprep.subr.bf16.mxu0 %v976_v25  ;;  %55 = vst [vmem:[#allocation3 + $0x3] sm:$0x1] %v53_v47  ;;  %66 = vst [vmem:[#allocation3 + $0x4] sm:$0x1] %v64_v48  ;;  %v992_v56 = vld [vmem:[#allocation3 + $0x1e] ss:$5 sps:$4 sm:$0xff]   ;;  %v317_v18 = vrot.slane %v991_v4, %v1141_v57 }
  0x19   :  { %920 = vmatpush3.bf16.msra.mxu1 %v975_v24  ;;  %v324_v62 = vrot.slane %v992_v56, %v1141_v57  ;;  %v994_v9 = vld [vmem:[#allocation3 + $0x22] ss:$5 sps:$4 sm:$0x11]  }
  0x1a   :  { %921 = vmatprep.subr.bf16.mxu1 %v978_v27  ;;  %v331_v19 = vrot.slane %v994_v9, %v1141_v57 }
  0x1b   :  { %900 = vmatpush3.bf16.msra.mxu0 %v977_v26  ;;  %v336_v0 = vcombine.high %v310_v60, %v324_v62  ;;  %v335_v2 = vcombine.low %v310_v60, %v324_v62  ;;  %v999_v26 = vld [vmem:[%s1180_s0 + $0x118] sm:$0xff]  }
  0x1c   :  { %901 = vmatprep.subr.bf16.mxu0 %v980_v29  ;;  %v337_v22 = vcombine.low %v317_v18, %v331_v19 }
  0x1d   :  { %922 = vmatpush3.bf16.msra.mxu1 %v979_v28  ;;  %v379_v6 = vrot.slane %v336_v0, %v1141_v57  ;;  %v365_v10 = vrot.slane %v335_v2, %v1141_v57 }
  0x1e   :  { %923 = vmatprep.subr.bf16.mxu1 %v982_v31  ;;  %v372_v25 = vrot.slane %v337_v22, %v1141_v57 }
  0x1f   :  { %902 = vmatpush3.bf16.msra.mxu0 %v981_v30  ;;  %v983_v58 = vld [vmem:[#allocation3] ss:$5 sps:$4 sm:$0xff]   ;;  %v985_v8 = vld [vmem:[#allocation3 + $0x4] ss:$5 sps:$4 sm:$0x11]  }
  0x20   :  { %936 = vmatprep.subr.bf16.mxu0 %v1001_v40  ;;  %v282_v61 = vrot.slane %v983_v58, %v1141_v57  ;;  %v289_v17 = vrot.slane %v985_v8, %v1141_v57  ;;  %v844_v30 = vld [vmem:[%s1181_s1] ss:$0 sm:$0xff] }
  0x21   :  { %924 = vmatpush3.bf16.msra.mxu1 %v995_v49 }
  0x22   :  { %v333_v63 = vcombine.high %v282_v61, %v296_v59  ;;  %v332_v1 = vcombine.low %v282_v61, %v296_v59  ;;  %v334_v21 = vcombine.low %v289_v17, %v303_v16 }
  0x24   :  { %v358_v5 = vrot.slane %v333_v63, %v1141_v57  ;;  %v344_v7 = vrot.slane %v332_v1, %v1141_v57  ;;  %v351_v24 = vrot.slane %v334_v21, %v1141_v57 }
  0x26   :  { %v383_v11 = vcombine.low %v358_v5, %v379_v6  ;;  %v384_v12 = vcombine.high %v358_v5, %v379_v6  ;;  %v380_v14 = vcombine.low %v344_v7, %v365_v10  ;;  %v381_v15 = vcombine.high %v344_v7, %v365_v10 }
  0x27   :  { %v382_v27 = vcombine.low %v351_v24, %v372_v25 }
  0x28   :  { %641 = vmatprep.mubr.bf16.mxu0 %v383_v11  ;;  %682 = vmatprep.mubr.bf16.mxu1 %v384_v12 }
  0x29   :  { %642 = vmatmul.mubr.bf16.vlgmr.msra.gmra.mrb[0].mxu0 %v380_v14  ;;  %683 = vmatmul.mubr.bf16.vlgmr.msra.gmra.mrb[0].mxu1 %v381_v15 }
  0x2a   :  { %937 = vmatpush3.bf16.msra.mxu0 %v996_v13  ;;  %944 = vmatprep.mubr.msk.bf16.mxu0 %vm1003_vm0, %v1001_v40 }
  0x2b   :  { %938 = vmatprep.subr.bf16.mxu0 %v1001_v40 }
  0x2e   :  { %939 = vmatpush3.bf16.msra.mxu0 %v997_v20 }
  0x2f   :  { %940 = vmatprep.subr.bf16.mxu0 %v1001_v40 }
  0x32   :  { %941 = vmatpush3.bf16.msra.mxu0 %v998_v23 }
  0x33   :  { %942 = vmatprep.subr.bf16.mxu0 %v1001_v40 }
  0x36   :  { %943 = vmatpush3.bf16.msra.mxu0 %v999_v26 }
  0x39   :  { %945 = vmatmul.mubr.msk.bf16.vlgmr.msra.gmra.mrb[4].mxu0 %vm605_vm1, %v382_v27 }
  0xfc   :  { %v903_v28 = vpop.f32.mrb[0].mxu0  ;;  %v925_v29 = vpop.f32.mrb[0].mxu1 }
  0xfd   :  { %v904_v31 = vpop.f32.mrb[1].mxu0  ;;  %v926_v32 = vpop.f32.mrb[1].mxu1 }
  0xfe   :  { %v905_v33 = vadd.f32 %v904_v31, %v903_v28  ;;  %v906_v34 = vpop.f32.mrb[2].mxu0  ;;  %v927_v35 = vadd.f32 %v926_v32, %v925_v29  ;;  %v928_v36 = vpop.f32.mrb[2].mxu1 }
  0xff   :  { %v907_v37 = vpop.f32.mrb[3].mxu0  ;;  %v929_v38 = vpop.f32.mrb[3].mxu1 }
 0x100   :  { %v644_v39 = vadd.f32 %v905_v33, %v844_v30  ;;  %v908_v40 = vadd.f32 %v907_v37, %v906_v34  ;;  %v930_v41 = vadd.f32 %v929_v38, %v928_v36 }
 0x102   :  { %v647_v42 = vadd.f32 %v908_v40, %v844_v30  ;;  %v685_v43 = vadd.f32 %v927_v35, %v644_v39 }
 0x104   :  { %v688_v44 = vadd.f32 %v930_v41, %v647_v42 }
 0x10c   :  { %v725_v45 = vpop.f32.mrb[4].mxu0 }
 0x10d   :  { %v726_v46 = vadd.f32 %v725_v45, %v685_v43  ;;  %v946_v47 = vpop.f32.mrb[5].mxu0 }
 0x10e   :  { %v728_v48 = vpop.f32.mrb[6].mxu0 }
 0x10f   :  { %v729_v49 = vadd.f32 %v728_v48, %v688_v44  ;;  %v947_v50 = vpop.f32.mrb[7].mxu0  ;;  %v732_v51 = vmax.f32 %v726_v46, 0.0 }
 0x111   :  { %v733_v52 = vmax.f32 %v729_v49, 0.0 }
 0x113   :  { %v734_v53 = vpack.c.bf16 %v733_v52, %v732_v51 }
 0x115   :  { %v743_v54 = vrot.slane %v734_v53, %v1141_v57 }
 0x117   :  { %883 = vst.sshfl [vmem:[#allocation2] sm:$0x1 pattern:$0x73625140] %v743_v54 }
 0x11e   :  { %v818_v55 = vld [vmem:[#allocation2] sm:$0x1] }
 0x11f   :  { %819 = vst [vmem:[%s1183_s3] sm:$0x1] %v818_v55 }

// kernel: dqn_forward.7
= control target key start
LH: loop header
LB: loop body
LE: loop exit
PB: predicated region body
PF: predicated region fallthrough
CT: control target
= control target key end

     0   :  { %10 = vsyncpa [#allocation3], 0  ;;  %v850_v1 = vmov 0   ;;  %v48_v5 = vlaneseq  ;;  %v851_v6 = vmov 1966171168   ;;  %vm205_vm0 = vcmask 523264   ;;  %s1078_s0 = inlined_call_operand.vmem [shape: bf16[2,64], index: 0, kind: input, shape index: {}]   ;;  %s1079_s1 = inlined_call_operand.vmem [shape: bf16[64,512], index: 1, kind: input, shape index: {}]   ;;  %s1080_s2 = inlined_call_operand.vmem [shape: f32[1,512], index: 2, kind: input, shape index: {}]   ;;  %s1081_s3 = inlined_call_operand.vmem [shape: bf16[512,128], index: 3, kind: input, shape index: {}]   ;;  %s1082_s4 = inlined_call_operand.vmem [shape: f32[1,128], index: 4, kind: input, shape index: {}]   ;;  %s1083_s5 = inlined_call_operand.hbm [shape: f32[2,128], index: 5, kind: output, shape index: {}]  }
   0x1   :  { %v770_v0 = vld [vmem:[%s1079_s1 + $0x4] ss:$16 sps:$4 sm:$0xff]   ;;  %241 = vmatprep.mubr.bf16.mxu0 %v850_v1  ;;  %284 = vmatprep.mubr.bf16.mxu1 %v850_v1  ;;  %v772_v2 = vld [vmem:[%s1079_s1 + $0xc] ss:$16 sps:$4 sm:$0xff]   ;;  %v774_v3 = vld [vmem:[%s1079_s1] ss:$16 sps:$4 sm:$0xff]   ;;  %v81_v7 = vunpack.c.l.s4 %v851_v6 }
   0x2   :  { %v775_v4 = vld [vmem:[%s1079_s1 + $0x8] ss:$16 sps:$4 sm:$0xff]   ;;  %209 = vmatprep.subr.bf16.mxu0 %v770_v0  ;;  %v776_v8 = vld [vmem:[%s1079_s1 + $0x24] ss:$16 sps:$4 sm:$0xff]   ;;  %252 = vmatprep.subr.bf16.mxu1 %v772_v2  ;;  %v778_v9 = vld [vmem:[%s1079_s1 + $0x2c] ss:$16 sps:$4 sm:$0xff]  }
   0x3   :  { %210 = vmatpush1.bf16.msra.mxu0 %v774_v3  ;;  %253 = vmatpush1.bf16.msra.mxu1 %v775_v4  ;;  %v780_v10 = vld [vmem:[%s1079_s1 + $0x20] ss:$16 sps:$4 sm:$0xff]   ;;  %v781_v11 = vld [vmem:[%s1079_s1 + $0x28] ss:$16 sps:$4 sm:$0xff]   ;;  %v782_v12 = vld [vmem:[%s1079_s1 + $0x44] ss:$16 sps:$4 sm:$0xff]   ;;  %v82_v14 = vunpack.c.0.s8 %v81_v7 }
   0x4   :  { %211 = vmatprep.subr.bf16.mxu0 %v776_v8  ;;  %254 = vmatprep.subr.bf16.mxu1 %v778_v9  ;;  %v912_v13 = vshrl.u32 %v48_v5, 7  ;;  %v784_v15 = vld [vmem:[%s1079_s1 + $0x4c] ss:$16 sps:$4 sm:$0xff]   ;;  %v786_v16 = vld [vmem:[%s1079_s1 + $0x40] ss:$16 sps:$4 sm:$0xff]  }
   0x5   :  { %v787_v17 = vld [vmem:[%s1079_s1 + $0x48] ss:$16 sps:$4 sm:$0xff]   ;;  %v788_v18 = vld [vmem:[%s1079_s1 + $0x64] ss:$16 sps:$4 sm:$0xff]   ;;  %v790_v19 = vld [vmem:[%s1079_s1 + $0x6c] ss:$16 sps:$4 sm:$0xff]  }
   0x6   :  { %v792_v20 = vld [vmem:[%s1079_s1 + $0x60] ss:$16 sps:$4 sm:$0xff]   ;;  %v85_v21 = vsub.s32 %v82_v14, %v912_v13  ;;  %v793_v22 = vld [vmem:[%s1079_s1 + $0x68] ss:$16 sps:$4 sm:$0xff]   ;;  %v26_v27 = vld [vmem:[%s1078_s0 + $0x4] sm:$0x1] }
   0x7   :  { %212 = vmatpush1.bf16.msra.mxu0 %v780_v10  ;;  %255 = vmatpush1.bf16.msra.mxu1 %v781_v11  ;;  %v22_v23 = vld [vmem:[%s1078_s0] sm:$0x1]  ;;  %v23_v24 = vld [vmem:[%s1078_s0 + $0x1] sm:$0x1]  ;;  %v24_v25 = vld [vmem:[%s1078_s0 + $0x2] sm:$0x1] }
   0x8   :  { %213 = vmatprep.subr.bf16.mxu0 %v782_v12  ;;  %256 = vmatprep.subr.bf16.mxu1 %v784_v15  ;;  %v25_v26 = vld [vmem:[%s1078_s0 + $0x3] sm:$0x1]  ;;  %v27_v28 = vld [vmem:[%s1078_s0 + $0x5] sm:$0x1]  ;;  %v76_v29 = vcombine.low %v22_v23, %v23_v24  ;;  %v28_v30 = vld [vmem:[%s1078_s0 + $0x6] sm:$0x1] }
   0x9   :  { %v29_v31 = vld [vmem:[%s1078_s0 + $0x7] sm:$0x1]  ;;  %v77_v32 = vcombine.low %v24_v25, %v25_v26  ;;  %v78_v33 = vcombine.low %v26_v27, %v27_v28  ;;  %v798_v47 = vld [vmem:[%s1081_s3 + $0x48] sm:$0xff]   ;;  %v802_v52 = vld [vmem:[%s1081_s3 + $0x50] sm:$0xff]   ;;  %v50_v12 = vsub.s32 0, %v912_v13  ;;  %v58_v14 = vsub.s32 2, %v912_v13 }
   0xa   :  { %v79_v34 = vcombine.low %v28_v30, %v29_v31  ;;  %v86_v35 = vrot.slane %v76_v29, %v85_v21  ;;  %v794_v36 = vld [vmem:[%s1081_s3 + $0x40] sm:$0xff]   ;;  %v799_v49 = vld [vmem:[%s1081_s3 + $0xc8] sm:$0xff]   ;;  %v803_v53 = vld [vmem:[%s1081_s3 + $0xd0] sm:$0xff]  }
   0xb   :  { %214 = vmatpush1.bf16.msra.mxu0 %v786_v16  ;;  %257 = vmatpush1.bf16.msra.mxu1 %v787_v17  ;;  %v93_v37 = vrot.slane %v77_v32, %v85_v21  ;;  %v100_v38 = vrot.slane %v78_v33, %v85_v21  ;;  %v795_v39 = vld [vmem:[%s1081_s3 + $0xc0] sm:$0xff]   ;;  %v800_v50 = vld [vmem:[%s1081_s3 + $0x8] sm:$0xff]   ;;  %v804_v54 = vld [vmem:[%s1081_s3 + $0x10] sm:$0xff]   ;;  %v54_v16 = vsub.s32 1, %v912_v13  ;;  %v62_v17 = vsub.s32 3, %v912_v13 }
   0xc   :  { %215 = vmatprep.subr.bf16.mxu0 %v788_v18  ;;  %258 = vmatprep.subr.bf16.mxu1 %v790_v19  ;;  %v107_v40 = vrot.slane %v79_v34, %v85_v21  ;;  %v796_v44 = vld [vmem:[%s1081_s3] sm:$0xff]   ;;  %v801_v51 = vld [vmem:[%s1081_s3 + $0x88] sm:$0xff]   ;;  %v805_v55 = vld [vmem:[%s1081_s3 + $0x90] sm:$0xff]  }
   0xd   :  { %v108_v41 = vcombine.low %v86_v35, %v93_v37  ;;  %v797_v46 = vld [vmem:[%s1081_s3 + $0x80] sm:$0xff]   ;;  %v806_v56 = vld [vmem:[%s1081_s3 + $0x58] sm:$0xff]   ;;  %v814_v0 = vld [vmem:[%s1081_s3 + $0x68] sm:$0xff]  }
   0xe   :  { %v109_v42 = vcombine.low %v100_v38, %v107_v40  ;;  %v807_v57 = vld [vmem:[%s1081_s3 + $0xd8] sm:$0xff]   ;;  %v810_v60 = vld [vmem:[%s1081_s3 + $0x60] sm:$0xff]   ;;  %v815_v1 = vld [vmem:[%s1081_s3 + $0xe8] sm:$0xff]  }
   0xf   :  { %216 = vmatpush1.bf16.msra.mxu0 %v792_v20  ;;  %259 = vmatpush1.bf16.msra.mxu1 %v793_v22  ;;  %v116_v43 = vrot.slane %v108_v41, %v85_v21  ;;  %v808_v58 = vld [vmem:[%s1081_s3 + $0x18] sm:$0xff]   ;;  %v811_v61 = vld [vmem:[%s1081_s3 + $0xe0] sm:$0xff]   ;;  %v816_v2 = vld [vmem:[%s1081_s3 + $0x28] sm:$0xff]  }
  0x10   :  { %721 = vmatprep.subr.bf16.mxu0 %v794_v36  ;;  %743 = vmatprep.subr.bf16.mxu1 %v795_v39  ;;  %v123_v45 = vrot.slane %v109_v42, %v85_v21  ;;  %v809_v59 = vld [vmem:[%s1081_s3 + $0x98] sm:$0xff]   ;;  %v812_v62 = vld [vmem:[%s1081_s3 + $0x20] sm:$0xff]   ;;  %v817_v3 = vld [vmem:[%s1081_s3 + $0xa8] sm:$0xff]  }
  0x11   :  { %v813_v63 = vld [vmem:[%s1081_s3 + $0xa0] sm:$0xff]   ;;  %v818_v4 = vld [vmem:[%s1081_s3 + $0x70] sm:$0xff]   ;;  %v822_v8 = vld [vmem:[%s1081_s3 + $0x78] sm:$0xff]  }
  0x12   :  { %v124_v48 = vcombine.low %v116_v43, %v123_v45  ;;  %v819_v5 = vld [vmem:[%s1081_s3 + $0xf0] sm:$0xff]   ;;  %v823_v9 = vld [vmem:[%s1081_s3 + $0xf8] sm:$0xff]   ;;  %v46_v15 = vld [vmem:[%s1080_s2] sm:$0xf] }
  0x13   :  { %v820_v6 = vld [vmem:[%s1081_s3 + $0x30] sm:$0xff]   ;;  %v824_v10 = vld [vmem:[%s1081_s3 + $0x38] sm:$0xff]   ;;  %v51_v18 = vrot.slane %v46_v15, %v50_v12  ;;  %v59_v19 = vrot.slane %v46_v15, %v58_v14  ;;  %v55_v20 = vrot.slane %v46_v15, %v54_v16  ;;  %v63_v21 = vrot.slane %v46_v15, %v62_v17 }
  0x14   :  { %686 = vmatmul.mubr.msk.bf16.vlgmr.msra.gmra.mrb[0].mxu0 %vm205_vm0, %v124_v48  ;;  %687 = vmatmul.mubr.msk.bf16.vlgmr.msra.gmra.mrb[0].mxu1 %vm205_vm0, %v124_v48  ;;  %v821_v7 = vld [vmem:[%s1081_s3 + $0xb0] sm:$0xff]   ;;  %v825_v11 = vld [vmem:[%s1081_s3 + $0xb8] sm:$0xff]  }
  0x15   :  { %722 = vmatpush3.bf16.msra.mxu0 %v796_v44  ;;  %744 = vmatpush3.bf16.msra.mxu1 %v797_v46 }
  0x16   :  { %723 = vmatprep.subr.bf16.mxu0 %v798_v47  ;;  %745 = vmatprep.subr.bf16.mxu1 %v799_v49 }
  0x19   :  { %724 = vmatpush3.bf16.msra.mxu0 %v800_v50  ;;  %746 = vmatpush3.bf16.msra.mxu1 %v801_v51  ;;  %v688_v51 = vld [vmem:[%s1082_s4] ss:$0 sm:$0xff] }
  0x1a   :  { %725 = vmatprep.subr.bf16.mxu0 %v802_v52  ;;  %747 = vmatprep.subr.bf16.mxu1 %v803_v53 }
  0x1d   :  { %726 = vmatpush3.bf16.msra.mxu0 %v804_v54  ;;  %748 = vmatpush3.bf16.msra.mxu1 %v805_v55 }
  0x1e   :  { %727 = vmatprep.subr.bf16.mxu0 %v806_v56  ;;  %749 = vmatprep.subr.bf16.mxu1 %v807_v57 }
  0x21   :  { %728 = vmatpush3.bf16.msra.mxu0 %v808_v58  ;;  %750 = vmatpush3.bf16.msra.mxu1 %v809_v59 }
  0x22   :  { %729 = vmatprep.subr.bf16.mxu0 %v810_v60  ;;  %751 = vmatprep.subr.bf16.mxu1 %v811_v61 }
  0x25   :  { %730 = vmatpush3.bf16.msra.mxu0 %v812_v62  ;;  %752 = vmatpush3.bf16.msra.mxu1 %v813_v63 }
  0x26   :  { %731 = vmatprep.subr.bf16.mxu0 %v814_v0  ;;  %753 = vmatprep.subr.bf16.mxu1 %v815_v1 }
  0x29   :  { %732 = vmatpush3.bf16.msra.mxu0 %v816_v2  ;;  %754 = vmatpush3.bf16.msra.mxu1 %v817_v3 }
  0x2a   :  { %733 = vmatprep.subr.bf16.mxu0 %v818_v4  ;;  %755 = vmatprep.subr.bf16.mxu1 %v819_v5 }
  0x2d   :  { %734 = vmatpush3.bf16.msra.mxu0 %v820_v6  ;;  %756 = vmatpush3.bf16.msra.mxu1 %v821_v7 }
  0x2e   :  { %735 = vmatprep.subr.bf16.mxu0 %v822_v8  ;;  %757 = vmatprep.subr.bf16.mxu1 %v823_v9 }
  0x31   :  { %736 = vmatpush3.bf16.msra.mxu0 %v824_v10  ;;  %758 = vmatpush3.bf16.msra.mxu1 %v825_v11 }
  0xe7   :  { %v243_v22 = vpop.f32.mrb[0].mxu0  ;;  %v286_v23 = vpop.f32.mrb[0].mxu1 }
  0xe8   :  { %v244_v24 = vadd.f32 %v243_v22, %v51_v18  ;;  %v287_v25 = vadd.f32 %v286_v23, %v59_v19  ;;  %v245_v26 = vpop.f32.mrb[1].mxu0  ;;  %v288_v27 = vpop.f32.mrb[1].mxu1 }
  0xe9   :  { %v246_v28 = vadd.f32 %v245_v26, %v55_v20  ;;  %v289_v29 = vadd.f32 %v288_v27, %v63_v21  ;;  %v247_v30 = vpop.f32.mrb[2].mxu0  ;;  %v290_v31 = vpop.f32.mrb[2].mxu1 }
  0xea   :  { %v297_v32 = vmax.f32 %v287_v25, 0.0  ;;  %v248_v33 = vadd.f32 %v247_v30, %v51_v18  ;;  %v291_v34 = vadd.f32 %v290_v31, %v59_v19  ;;  %v249_v35 = vpop.f32.mrb[3].mxu0  ;;  %v292_v36 = vpop.f32.mrb[3].mxu1  ;;  %v295_v39 = vmax.f32 %v244_v24, 0.0 }
  0xeb   :  { %v298_v13 = vmax.f32 %v289_v29, 0.0  ;;  %v250_v37 = vadd.f32 %v249_v35, %v55_v20  ;;  %v293_v38 = vadd.f32 %v292_v36, %v63_v21  ;;  %v296_v42 = vmax.f32 %v246_v28, 0.0 }
  0xec   :  { %v299_v40 = vmax.f32 %v248_v33, 0.0  ;;  %v301_v41 = vmax.f32 %v291_v34, 0.0 }
  0xed   :  { %v300_v43 = vmax.f32 %v250_v37, 0.0  ;;  %v302_v44 = vmax.f32 %v293_v38, 0.0 }
  0xee   :  { %v303_v45 = vpack.c.bf16 %v299_v40, %v295_v39  ;;  %v305_v46 = vpack.c.bf16 %v301_v41, %v297_v32 }
  0xef   :  { %v304_v47 = vpack.c.bf16 %v300_v43, %v296_v42  ;;  %v306_v48 = vpack.c.bf16 %v302_v44, %v298_v13 }
  0xf1   :  { %602 = vmatprep.mubr.bf16.mxu0 %v304_v47  ;;  %643 = vmatprep.mubr.bf16.mxu1 %v306_v48 }
  0xf2   :  { %603 = vmatmul.mubr.bf16.vlgmr.msra.gmra.mrb[4].mxu0 %v303_v45  ;;  %644 = vmatmul.mubr.bf16.vlgmr.msra.gmra.mrb[4].mxu1 %v305_v46 }
 0x1c5   :  { %v737_v49 = vpop.f32.mrb[4].mxu0  ;;  %v759_v50 = vpop.f32.mrb[4].mxu1 }
 0x1c6   :  { %v738_v52 = vpop.f32.mrb[5].mxu0  ;;  %v760_v53 = vpop.f32.mrb[5].mxu1 }
 0x1c7   :  { %v739_v54 = vadd.f32 %v738_v52, %v737_v49  ;;  %v761_v55 = vadd.f32 %v760_v53, %v759_v50  ;;  %v740_v56 = vpop.f32.mrb[6].mxu0  ;;  %v762_v57 = vpop.f32.mrb[6].mxu1 }
 0x1c8   :  { %v741_v58 = vpop.f32.mrb[7].mxu0  ;;  %v763_v59 = vpop.f32.mrb[7].mxu1 }
 0x1c9   :  { %v605_v60 = vadd.f32 %v739_v54, %v688_v51  ;;  %v742_v61 = vadd.f32 %v741_v58, %v740_v56  ;;  %v764_v62 = vadd.f32 %v763_v59, %v762_v57 }
 0x1cb   :  { %v646_v63 = vadd.f32 %v761_v55, %v605_v60  ;;  %v608_v0 = vadd.f32 %v742_v61, %v688_v51 }
 0x1cd   :  { %652 = vst [vmem:[#allocation2] sm:$0xff] %v646_v63  ;;  %v649_v1 = vadd.f32 %v764_v62, %v608_v0 }
 0x1cf   :  { %653 = vst [vmem:[#allocation2 + $0x8] sm:$0xff] %v649_v1 }
 0x1d0   :  { %658 = vsyncadd [#allocation3], 224  ;;  %s852_s26 = smov [#allocation2]  }
 0x1d1   :  { %s659_s27 = sshll.u32 %s852_s26, 4  ;;  %s660_s27 = int_to_ptr.vmem [resolvable:$true] %s659_s27 }
 0x1d2   :  { %s826_s4 = scalar_lea.vmem %s660_s27, 32  ;;  %s830_s28 = scalar_lea.vmem %s660_s27, 256 }
 0x1d3   :  { %p827_p0 = scmp.ne.s32.totalorder %s660_s27, %s826_s4  ;;  %p831_p1 = scmp.lt.s32.totalorder %s660_s27, %s660_s27 }
 0x1d4   :  { %p832_p2 = scmp.lt.s32.totalorder %s830_s28, %s826_s4 }
 0x1d6   :  { %p833_p3 = por %p832_p2, %p831_p1 }
 0x1d8   :  { %p834_p4 = pnand %p833_p3, %p827_p0 }
 0x1da   :  { %837 = shalt.err (!%p834_p4)
}
 0x1db   :  { %s838_s6 = scalar_lea.hbm %s1083_s5, 32 }
 0x1dc   :  { %p839_p5 = scmp.ne.s32.totalorder %s1083_s5, %s838_s6  ;;  %p842_p6 = scmp.lt.u32.totalorder %s838_s6, %s1083_s5 }
 0x1de   :  { %p844_p7 = pnand %p842_p6, %p839_p5 }
 0x1e0   :  { %847 = shalt.err (!%p844_p7)
}
 0x1e1   :  { %s853_s10 = smov 32   ;;  %s854_s11 = smov 2  }
 0x1e2   :  { %665 = dma.vmem_to_hbm [thread:$0]  %s660_s27, 32, %s1083_s5, [#allocation3], %s853_s10, %s853_s10, %s854_s11  }
 0x1e3   :  { %848 = dma.done.wait [#allocation3], 256  }
 0x1e4   :  { %849 = vsyncadd [#allocation3], 4294967040 }
 0x1e5   :  { %669 = vsyncpa [#allocation3], 1 }

</bundles_post_ra>
